<compile_context>
chip_gen: v5e
topology: v5e:2x2
jax: 0.10.0
libtpu: 0.0.40
codegen_flags: <defaults>
</compile_context>

<pallas_src>
import math

import jax
import jax.numpy as jnp
import numpy as np
from jax import lax
from jax.experimental import pallas as pl
from jax.experimental.pallas import tpu as pltpu

D_MODEL = 32
NUM_HEAD = 4
P_DROPOUT = 0.0
LN_EPS = 1e-5


def _layer_norm(x, w, b):
    mean = jnp.mean(x, axis=-1, keepdims=True)
    var = jnp.mean((x - mean) ** 2, axis=-1, keepdims=True)
    return (x - mean) * lax.rsqrt(var + LN_EPS) * w + b


def _make_kernel(S, D, H):
    dh = D // H

    def kernel(x_ref,
               ln1_w_ref, ln1_b_ref,
               wqkv_ref, bqkv_ref,
               wo_ref, bo_ref,
               ln2_w_ref, ln2_b_ref,
               w1_ref, b1_ref, w2_ref, b2_ref,
               o_ref):
        # One batch element per grid step: (S, D), f32 math for all elementwise work.
        x = x_ref[...].astype(jnp.float32)

        # ---------------- attention sub-block ----------------
        xn = _layer_norm(x, ln1_w_ref[...], ln1_b_ref[...])           # (S, D) f32

        # Fused QKV: one (S, D) @ (D, 3D) bf16 matmul, f32 accumulate + f32 bias.
        # 1/sqrt(dh) is already folded into the Q columns of wqkv/bqkv by the wrapper.
        qkv = jnp.dot(xn.astype(jnp.bfloat16), wqkv_ref[...],
                      preferred_element_type=jnp.float32) + bqkv_ref[...]   # (S, 3D)

        q3 = qkv[:, :D].reshape(S, H, dh).astype(jnp.bfloat16)
        k3 = qkv[:, D:2 * D].reshape(S, H, dh).astype(jnp.bfloat16)
        v3 = qkv[:, 2 * D:].reshape(S, H, dh).astype(jnp.bfloat16)

        # Per-head scores for this batch element only: (H, S, S), f32 accumulation.
        scores = jnp.einsum('qhd,khd->hqk', q3, k3,
                            preferred_element_type=jnp.float32)

        # Causal mask only (batch lives on the grid; no block-diagonal mask needed).
        row = lax.broadcasted_iota(jnp.int32, (S, S), 0)
        col = lax.broadcasted_iota(jnp.int32, (S, S), 1)
        scores = jnp.where((col <= row)[None, :, :], scores, jnp.float32(-1e30))

        m = jnp.max(scores, axis=-1, keepdims=True)
        p = jnp.exp(scores - m)
        denom = jnp.sum(p, axis=-1, keepdims=True)
        p = p * pl.reciprocal(denom, approx=True)                     # EUP, off the VALU

        ctx = jnp.einsum('hqk,khd->qhd', p.astype(jnp.bfloat16), v3,
                         preferred_element_type=jnp.float32).reshape(S, D)
        attn = jnp.dot(ctx.astype(jnp.bfloat16), wo_ref[...],
                       preferred_element_type=jnp.float32) + bo_ref[...]

        x1 = x + attn                                                 # first residual

        # ---------------- feed-forward sub-block ----------------
        xn2 = _layer_norm(x1, ln2_w_ref[...], ln2_b_ref[...])
        h = jnp.dot(xn2.astype(jnp.bfloat16), w1_ref[...],
                    preferred_element_type=jnp.float32) + b1_ref[...]
        h = jnp.maximum(h, 0.0)                                       # ReLU in f32
        ff = jnp.dot(h.astype(jnp.bfloat16), w2_ref[...],
                     preferred_element_type=jnp.float32) + b2_ref[...]

        o_ref[...] = (x1 + ff).astype(o_ref.dtype)

    return kernel


def init_params(key, d_model=D_MODEL):
    d_ff = 4 * d_model
    ks = jax.random.split(key, 8)
    n = lambda k, shp: (0.02 * jax.random.normal(k, shp)).astype(jnp.float32)
    return dict(
        ln1_w=jnp.ones((1, d_model), jnp.float32),
        ln1_b=jnp.zeros((1, d_model), jnp.float32),
        wq=n(ks[0], (d_model, d_model)), bq=n(ks[1], (1, d_model)),
        wk=n(ks[2], (d_model, d_model)), bk=jnp.zeros((1, d_model), jnp.float32),
        wv=n(ks[3], (d_model, d_model)), bv=jnp.zeros((1, d_model), jnp.float32),
        wo=n(ks[4], (d_model, d_model)), bo=jnp.zeros((1, d_model), jnp.float32),
        ln2_w=jnp.ones((1, d_model), jnp.float32),
        ln2_b=jnp.zeros((1, d_model), jnp.float32),
        w1=n(ks[5], (d_model, d_ff)), b1=n(ks[6], (1, d_ff)),
        w2=n(ks[7], (d_ff, d_model)), b2=jnp.zeros((1, d_model), jnp.float32),
    )


def decoder_block(x, params, num_head=NUM_HEAD):
    B, S, D = x.shape
    dh = D // num_head
    scale = jnp.float32(1.0 / math.sqrt(dh))

    # One-time weight prep (trace-time, not per-invocation activation work):
    #   * fuse Q/K/V weights & biases into a single (D, 3D) / (1, 3D) pair,
    #   * fold 1/sqrt(dh) into the Q columns of BOTH the weight and the bias,
    #   * cast MXU weight operands to bf16 (biases stay f32 for the accumulate-add).
    w_qkv = jnp.concatenate(
        [params["wq"] * scale, params["wk"], params["wv"]], axis=1)   # (D, 3D)
    b_qkv = jnp.concatenate(
        [params["bq"] * scale, params["bk"], params["bv"]], axis=1)   # (1, 3D)
    bf16 = lambda w: w.astype(jnp.bfloat16)

    args = [
        x,
        params["ln1_w"], params["ln1_b"],
        bf16(w_qkv), b_qkv,
        bf16(params["wo"]), params["bo"],
        params["ln2_w"], params["ln2_b"],
        bf16(params["w1"]), params["b1"], bf16(params["w2"]), params["b2"],
    ]

    # Activations tiled per batch element; the leading dim is squeezed in the kernel.
    x_spec = pl.BlockSpec((None, S, D), lambda b: (b, 0, 0))
    out_spec = pl.BlockSpec((None, S, D), lambda b: (b, 0, 0))

    # Weights: full-shape blocks with a constant index map -> VMEM-resident across
    # grid steps (no re-DMA when the block index does not change).
    def resident(a):
        shape = a.shape
        return pl.BlockSpec(shape, lambda b, _n=len(shape): (0,) * _n)

    in_specs = [x_spec] + [resident(a) for a in args[1:]]

    return pl.pallas_call(
        _make_kernel(S, D, num_head),
        out_shape=jax.ShapeDtypeStruct((B, S, D), x.dtype),
        grid=(B,),
        in_specs=in_specs,
        out_specs=out_spec,
        compiler_params=pltpu.CompilerParams(
            dimension_semantics=("parallel",)),
    )(*args)


def decoder_block_ref(x, params):
    """Pure-JAX reference for correctness checking."""
    B, S, D = x.shape
    H, dh = NUM_HEAD, D // NUM_HEAD

    def ln(y, w, b):
        mu = jnp.mean(y, -1, keepdims=True)
        var = jnp.mean((y - mu) ** 2, -1, keepdims=True)
        return (y - mu) / jnp.sqrt(var + LN_EPS) * w[0] + b[0]

    xn = ln(x, params["ln1_w"], params["ln1_b"])
    q = (xn @ params["wq"] + params["bq"][0]).reshape(B, S, H, dh)
    k = (xn @ params["wk"] + params["bk"][0]).reshape(B, S, H, dh)
    v = (xn @ params["wv"] + params["bv"][0]).reshape(B, S, H, dh)
    s = jnp.einsum('bqhd,bkhd->bhqk', q, k) / jnp.sqrt(dh)
    mask = jnp.tril(jnp.ones((S, S), bool))
    s = jnp.where(mask[None, None], s, -1e30)
    p = jax.nn.softmax(s, axis=-1)
    a = jnp.einsum('bhqk,bkhd->bqhd', p, v).reshape(B, S, D)
    x1 = x + a @ params["wo"] + params["bo"][0]
    xn2 = ln(x1, params["ln2_w"], params["ln2_b"])
    ff = jnp.maximum(xn2 @ params["w1"] + params["b1"][0], 0.0) @ params["w2"] + params["b2"][0]
    return x1 + ff


if __name__ == "__main__":
    key = jax.random.PRNGKey(0)
    kx, kp = jax.random.split(key)

    B, S, D = 2, 8, D_MODEL
    x = jax.random.normal(kx, (B, S, D), dtype=jnp.float32)
    params = init_params(kp, D)

    out = decoder_block(x, params)
    out = jax.block_until_ready(out)

    ref = decoder_block_ref(x, params)
    np.testing.assert_allclose(np.asarray(out), np.asarray(ref),
                               rtol=2e-3, atol=2e-3)
    print("KERNEL_OK")
</pallas_src>

<mosaic_0001>
module attributes {stable_mosaic.version = 11 : i64} {
  func.func @kernel(%arg0: i32, %arg1: memref<1x8x32xf32, #tpu.memory_space<vmem>>, %arg2: memref<1x32xf32, #tpu.memory_space<vmem>>, %arg3: memref<1x32xf32, #tpu.memory_space<vmem>>, %arg4: memref<32x96xbf16, #tpu.memory_space<vmem>>, %arg5: memref<1x96xf32, #tpu.memory_space<vmem>>, %arg6: memref<32x32xbf16, #tpu.memory_space<vmem>>, %arg7: memref<1x32xf32, #tpu.memory_space<vmem>>, %arg8: memref<1x32xf32, #tpu.memory_space<vmem>>, %arg9: memref<1x32xf32, #tpu.memory_space<vmem>>, %arg10: memref<32x128xbf16, #tpu.memory_space<vmem>>, %arg11: memref<1x128xf32, #tpu.memory_space<vmem>>, %arg12: memref<128x32xbf16, #tpu.memory_space<vmem>>, %arg13: memref<1x32xf32, #tpu.memory_space<vmem>>, %arg14: memref<1x8x32xf32, #tpu.memory_space<vmem>>) attributes {dimension_semantics = [#tpu.dimension_semantics<parallel>], iteration_bounds = array<i64: 2>, scalar_prefetch = 0 : i64, scratch_operands = 0 : i64, tpu.core_type = #tpu.core_type<tc>, window_params = [{transform_indices = @transform_0, window_bounds = array<i64: 1, 8, 32>}, {pipeline_mode = #tpu.pipeline_mode<synchronous>, transform_indices = @transform_1, window_bounds = array<i64: 1, 32>}, {pipeline_mode = #tpu.pipeline_mode<synchronous>, transform_indices = @transform_2, window_bounds = array<i64: 1, 32>}, {pipeline_mode = #tpu.pipeline_mode<synchronous>, transform_indices = @transform_3, window_bounds = array<i64: 32, 96>}, {pipeline_mode = #tpu.pipeline_mode<synchronous>, transform_indices = @transform_4, window_bounds = array<i64: 1, 96>}, {pipeline_mode = #tpu.pipeline_mode<synchronous>, transform_indices = @transform_5, window_bounds = array<i64: 32, 32>}, {pipeline_mode = #tpu.pipeline_mode<synchronous>, transform_indices = @transform_6, window_bounds = array<i64: 1, 32>}, {pipeline_mode = #tpu.pipeline_mode<synchronous>, transform_indices = @transform_7, window_bounds = array<i64: 1, 32>}, {pipeline_mode = #tpu.pipeline_mode<synchronous>, transform_indices = @transform_8, window_bounds = array<i64: 1, 32>}, {pipeline_mode = #tpu.pipeline_mode<synchronous>, transform_indices = @transform_9, window_bounds = array<i64: 32, 128>}, {pipeline_mode = #tpu.pipeline_mode<synchronous>, transform_indices = @transform_10, window_bounds = array<i64: 1, 128>}, {pipeline_mode = #tpu.pipeline_mode<synchronous>, transform_indices = @transform_11, window_bounds = array<i64: 128, 32>}, {pipeline_mode = #tpu.pipeline_mode<synchronous>, transform_indices = @transform_12, window_bounds = array<i64: 1, 32>}, {transform_indices = @transform_13, window_bounds = array<i64: 1, 8, 32>}]} {
    %c0 = arith.constant 0 : index
    %c0_0 = arith.constant 0 : index
    %c0_1 = arith.constant 0 : index
    %0 = vector.load %arg1[%c0, %c0_0, %c0_1] : memref<1x8x32xf32, #tpu.memory_space<vmem>>, vector<1x8x32xf32>
    %1 = vector.shape_cast %0 : vector<1x8x32xf32> to vector<8x32xf32>
    %c0_2 = arith.constant 0 : index
    %c0_3 = arith.constant 0 : index
    %2 = vector.load %arg2[%c0_2, %c0_3] : memref<1x32xf32, #tpu.memory_space<vmem>>, vector<1x32xf32>
    %c0_4 = arith.constant 0 : index
    %c0_5 = arith.constant 0 : index
    %3 = vector.load %arg3[%c0_4, %c0_5] : memref<1x32xf32, #tpu.memory_space<vmem>>, vector<1x32xf32>
    %cst = arith.constant dense<0.000000e+00> : vector<8xf32>
    %4 = vector.multi_reduction <add>, %1, %cst [1] : vector<8x32xf32> to vector<8xf32>
    %5 = vector.shape_cast %4 : vector<8xf32> to vector<8x1xf32>
    %cst_6 = arith.constant 3.200000e+01 : f32
    %6 = vector.broadcast %cst_6 : f32 to vector<8x1xf32>
    %7 = arith.divf %5, %6 : vector<8x1xf32>
    %8 = vector.broadcast %7 : vector<8x1xf32> to vector<8x32xf32>
    %9 = arith.subf %1, %8 : vector<8x32xf32>
    %10 = arith.mulf %9, %9 : vector<8x32xf32>
    %cst_7 = arith.constant dense<0.000000e+00> : vector<8xf32>
    %11 = vector.multi_reduction <add>, %10, %cst_7 [1] : vector<8x32xf32> to vector<8xf32>
    %12 = vector.shape_cast %11 : vector<8xf32> to vector<8x1xf32>
    %cst_8 = arith.constant 3.200000e+01 : f32
    %13 = vector.broadcast %cst_8 : f32 to vector<8x1xf32>
    %14 = arith.divf %12, %13 : vector<8x1xf32>
    %15 = vector.broadcast %7 : vector<8x1xf32> to vector<8x32xf32>
    %16 = arith.subf %1, %15 : vector<8x32xf32>
    %cst_9 = arith.constant 9.99999974E-6 : f32
    %17 = vector.broadcast %cst_9 : f32 to vector<8x1xf32>
    %18 = arith.addf %14, %17 : vector<8x1xf32>
    %19 = math.rsqrt %18 : vector<8x1xf32>
    %20 = vector.broadcast %19 : vector<8x1xf32> to vector<8x32xf32>
    %21 = arith.mulf %16, %20 : vector<8x32xf32>
    %22 = vector.broadcast %2 : vector<1x32xf32> to vector<8x32xf32>
    %23 = arith.mulf %21, %22 : vector<8x32xf32>
    %24 = vector.broadcast %3 : vector<1x32xf32> to vector<8x32xf32>
    %25 = arith.addf %23, %24 : vector<8x32xf32>
    %26 = arith.truncf %25 : vector<8x32xf32> to vector<8x32xbf16>
    %c0_10 = arith.constant 0 : index
    %c0_11 = arith.constant 0 : index
    %27 = vector.load %arg4[%c0_10, %c0_11] : memref<32x96xbf16, #tpu.memory_space<vmem>>, vector<32x96xbf16>
    %cst_12 = arith.constant dense<0.000000e+00> : vector<8x96xf32>
    %28 = tpu.matmul %26, %27, %cst_12 {dimension_numbers = #tpu.dot_dimension_numbers<[1], [0], [0], [1], [0, 0, 1, 1], [], []>} : vector<8x32xbf16>, vector<32x96xbf16>, vector<8x96xf32> -> vector<8x96xf32>
    %c0_13 = arith.constant 0 : index
    %c0_14 = arith.constant 0 : index
    %29 = vector.load %arg5[%c0_13, %c0_14] : memref<1x96xf32, #tpu.memory_space<vmem>>, vector<1x96xf32>
    %30 = vector.broadcast %29 : vector<1x96xf32> to vector<8x96xf32>
    %31 = arith.addf %28, %30 : vector<8x96xf32>
    %32 = vector.extract_strided_slice %31 {offsets = [0, 0], sizes = [8, 32], strides = [1, 1]} : vector<8x96xf32> to vector<8x32xf32>
    %33 = vector.shape_cast %32 : vector<8x32xf32> to vector<8x4x8xf32>
    %34 = arith.truncf %33 : vector<8x4x8xf32> to vector<8x4x8xbf16>
    %35 = vector.extract_strided_slice %31 {offsets = [0, 32], sizes = [8, 32], strides = [1, 1]} : vector<8x96xf32> to vector<8x32xf32>
    %36 = vector.shape_cast %35 : vector<8x32xf32> to vector<8x4x8xf32>
    %37 = arith.truncf %36 : vector<8x4x8xf32> to vector<8x4x8xbf16>
    %38 = vector.extract_strided_slice %31 {offsets = [0, 64], sizes = [8, 32], strides = [1, 1]} : vector<8x96xf32> to vector<8x32xf32>
    %39 = vector.shape_cast %38 : vector<8x32xf32> to vector<8x4x8xf32>
    %40 = arith.truncf %39 : vector<8x4x8xf32> to vector<8x4x8xbf16>
    "tpu.trace_start"() <{level = 10 : i32, message = "qhd,khd->hqk"}> : () -> ()
    %cst_15 = arith.constant dense<0.000000e+00> : vector<4x8x8xf32>
    %41 = tpu.matmul %34, %37, %cst_15 {dimension_numbers = #tpu.dot_dimension_numbers<[2], [2], [0], [0], [0, 1, 0, 0, 1, 0], [1], [1]>} : vector<8x4x8xbf16>, vector<8x4x8xbf16>, vector<4x8x8xf32> -> vector<4x8x8xf32>
    "tpu.trace_stop"() : () -> ()
    %42 = tpu.iota {dimensions = array<i32: 0>} : vector<8x8xi32>
    %43 = tpu.iota {dimensions = array<i32: 1>} : vector<8x8xi32>
    %44 = arith.cmpi sle, %43, %42 : vector<8x8xi32>
    %45 = vector.shape_cast %44 : vector<8x8xi1> to vector<1x8x8xi1>
    %cst_16 = arith.constant -1.000000e+30 : f32
    %46 = vector.shape_cast %45 : vector<1x8x8xi1> to vector<1x8x8xi1>
    %47 = vector.broadcast %46 : vector<1x8x8xi1> to vector<4x8x8xi1>
    %48 = vector.broadcast %cst_16 : f32 to vector<4x8x8xf32>
    %49 = arith.select %47, %41, %48 : vector<4x8x8xi1>, vector<4x8x8xf32>
    %cst_17 = arith.constant dense<0xFF800000> : vector<4x8xf32>
    %50 = vector.multi_reduction <maximumf>, %49, %cst_17 [2] : vector<4x8x8xf32> to vector<4x8xf32>
    %51 = vector.shape_cast %50 : vector<4x8xf32> to vector<4x8x1xf32>
    %52 = vector.broadcast %51 : vector<4x8x1xf32> to vector<4x8x8xf32>
    %53 = arith.subf %49, %52 : vector<4x8x8xf32>
    %54 = math.exp %53 : vector<4x8x8xf32>
    %cst_18 = arith.constant dense<0.000000e+00> : vector<4x8xf32>
    %55 = vector.multi_reduction <add>, %54, %cst_18 [2] : vector<4x8x8xf32> to vector<4x8xf32>
    %56 = vector.shape_cast %55 : vector<4x8xf32> to vector<4x8x1xf32>
    %57 = tpu.reciprocal %56 {approx = true} : vector<4x8x1xf32> -> vector<4x8x1xf32>
    %58 = vector.broadcast %57 : vector<4x8x1xf32> to vector<4x8x8xf32>
    %59 = arith.mulf %54, %58 : vector<4x8x8xf32>
    %60 = arith.truncf %59 : vector<4x8x8xf32> to vector<4x8x8xbf16>
    "tpu.trace_start"() <{level = 10 : i32, message = "hqk,khd->qhd"}> : () -> ()
    %cst_19 = arith.constant dense<0.000000e+00> : vector<4x8x8xf32>
    %61 = tpu.matmul %40, %60, %cst_19 {dimension_numbers = #tpu.dot_dimension_numbers<[0], [2], [2], [1], [0, 1, 0, 2, 1, 1], [1], [0]>} : vector<8x4x8xbf16>, vector<4x8x8xbf16>, vector<4x8x8xf32> -> vector<4x8x8xf32>
    %62 = tpu.transpose %61, [2, 0, 1] : vector<4x8x8xf32> -> vector<8x4x8xf32>
    "tpu.trace_stop"() : () -> ()
    %63 = vector.shape_cast %62 : vector<8x4x8xf32> to vector<8x32xf32>
    %64 = arith.truncf %63 : vector<8x32xf32> to vector<8x32xbf16>
    %c0_20 = arith.constant 0 : index
    %c0_21 = arith.constant 0 : index
    %65 = vector.load %arg6[%c0_20, %c0_21] : memref<32x32xbf16, #tpu.memory_space<vmem>>, vector<32x32xbf16>
    %cst_22 = arith.constant dense<0.000000e+00> : vector<8x32xf32>
    %66 = tpu.matmul %64, %65, %cst_22 {dimension_numbers = #tpu.dot_dimension_numbers<[1], [0], [0], [1], [0, 0, 1, 1], [], []>} : vector<8x32xbf16>, vector<32x32xbf16>, vector<8x32xf32> -> vector<8x32xf32>
    %c0_23 = arith.constant 0 : index
    %c0_24 = arith.constant 0 : index
    %67 = vector.load %arg7[%c0_23, %c0_24] : memref<1x32xf32, #tpu.memory_space<vmem>>, vector<1x32xf32>
    %68 = vector.broadcast %67 : vector<1x32xf32> to vector<8x32xf32>
    %69 = arith.addf %66, %68 : vector<8x32xf32>
    %70 = arith.addf %1, %69 : vector<8x32xf32>
    %c0_25 = arith.constant 0 : index
    %c0_26 = arith.constant 0 : index
    %71 = vector.load %arg8[%c0_25, %c0_26] : memref<1x32xf32, #tpu.memory_space<vmem>>, vector<1x32xf32>
    %c0_27 = arith.constant 0 : index
    %c0_28 = arith.constant 0 : index
    %72 = vector.load %arg9[%c0_27, %c0_28] : memref<1x32xf32, #tpu.memory_space<vmem>>, vector<1x32xf32>
    %cst_29 = arith.constant dense<0.000000e+00> : vector<8xf32>
    %73 = vector.multi_reduction <add>, %70, %cst_29 [1] : vector<8x32xf32> to vector<8xf32>
    %74 = vector.shape_cast %73 : vector<8xf32> to vector<8x1xf32>
    %cst_30 = arith.constant 3.200000e+01 : f32
    %75 = vector.broadcast %cst_30 : f32 to vector<8x1xf32>
    %76 = arith.divf %74, %75 : vector<8x1xf32>
    %77 = vector.broadcast %76 : vector<8x1xf32> to vector<8x32xf32>
    %78 = arith.subf %70, %77 : vector<8x32xf32>
    %79 = arith.mulf %78, %78 : vector<8x32xf32>
    %cst_31 = arith.constant dense<0.000000e+00> : vector<8xf32>
    %80 = vector.multi_reduction <add>, %79, %cst_31 [1] : vector<8x32xf32> to vector<8xf32>
    %81 = vector.shape_cast %80 : vector<8xf32> to vector<8x1xf32>
    %cst_32 = arith.constant 3.200000e+01 : f32
    %82 = vector.broadcast %cst_32 : f32 to vector<8x1xf32>
    %83 = arith.divf %81, %82 : vector<8x1xf32>
    %84 = vector.broadcast %76 : vector<8x1xf32> to vector<8x32xf32>
    %85 = arith.subf %70, %84 : vector<8x32xf32>
    %cst_33 = arith.constant 9.99999974E-6 : f32
    %86 = vector.broadcast %cst_33 : f32 to vector<8x1xf32>
    %87 = arith.addf %83, %86 : vector<8x1xf32>
    %88 = math.rsqrt %87 : vector<8x1xf32>
    %89 = vector.broadcast %88 : vector<8x1xf32> to vector<8x32xf32>
    %90 = arith.mulf %85, %89 : vector<8x32xf32>
    %91 = vector.broadcast %71 : vector<1x32xf32> to vector<8x32xf32>
    %92 = arith.mulf %90, %91 : vector<8x32xf32>
    %93 = vector.broadcast %72 : vector<1x32xf32> to vector<8x32xf32>
    %94 = arith.addf %92, %93 : vector<8x32xf32>
    %95 = arith.truncf %94 : vector<8x32xf32> to vector<8x32xbf16>
    %c0_34 = arith.constant 0 : index
    %c0_35 = arith.constant 0 : index
    %96 = vector.load %arg10[%c0_34, %c0_35] : memref<32x128xbf16, #tpu.memory_space<vmem>>, vector<32x128xbf16>
    %cst_36 = arith.constant dense<0.000000e+00> : vector<8x128xf32>
    %97 = tpu.matmul %95, %96, %cst_36 {dimension_numbers = #tpu.dot_dimension_numbers<[1], [0], [0], [1], [0, 0, 1, 1], [], []>} : vector<8x32xbf16>, vector<32x128xbf16>, vector<8x128xf32> -> vector<8x128xf32>
    %c0_37 = arith.constant 0 : index
    %c0_38 = arith.constant 0 : index
    %98 = vector.load %arg11[%c0_37, %c0_38] : memref<1x128xf32, #tpu.memory_space<vmem>>, vector<1x128xf32>
    %99 = vector.broadcast %98 : vector<1x128xf32> to vector<8x128xf32>
    %100 = arith.addf %97, %99 : vector<8x128xf32>
    %cst_39 = arith.constant 0.000000e+00 : f32
    %101 = vector.broadcast %cst_39 : f32 to vector<8x128xf32>
    %102 = arith.maximumf %100, %101 : vector<8x128xf32>
    %103 = arith.truncf %102 : vector<8x128xf32> to vector<8x128xbf16>
    %c0_40 = arith.constant 0 : index
    %c0_41 = arith.constant 0 : index
    %104 = vector.load %arg12[%c0_40, %c0_41] : memref<128x32xbf16, #tpu.memory_space<vmem>>, vector<128x32xbf16>
    %cst_42 = arith.constant dense<0.000000e+00> : vector<8x32xf32>
    %105 = tpu.matmul %103, %104, %cst_42 {dimension_numbers = #tpu.dot_dimension_numbers<[1], [0], [0], [1], [0, 0, 1, 1], [], []>} : vector<8x128xbf16>, vector<128x32xbf16>, vector<8x32xf32> -> vector<8x32xf32>
    %c0_43 = arith.constant 0 : index
    %c0_44 = arith.constant 0 : index
    %106 = vector.load %arg13[%c0_43, %c0_44] : memref<1x32xf32, #tpu.memory_space<vmem>>, vector<1x32xf32>
    %107 = vector.broadcast %106 : vector<1x32xf32> to vector<8x32xf32>
    %108 = arith.addf %105, %107 : vector<8x32xf32>
    %109 = arith.addf %70, %108 : vector<8x32xf32>
    %c0_45 = arith.constant 0 : index
    %c0_46 = arith.constant 0 : index
    %c0_47 = arith.constant 0 : index
    %110 = vector.load %arg14[%c0_45, %c0_46, %c0_47] : memref<1x8x32xf32, #tpu.memory_space<vmem>>, vector<1x8x32xf32>
    %111 = vector.shape_cast %110 : vector<1x8x32xf32> to vector<8x32xf32>
    %112 = vector.shape_cast %109 : vector<8x32xf32> to vector<1x8x32xf32>
    tpu.vector_store %arg14[%c0_45, %c0_46, %c0_47], %112 {strides = array<i32>} : memref<1x8x32xf32, #tpu.memory_space<vmem>>, vector<1x8x32xf32>,
    return
  }
  func.func @transform_0(%arg0: i32) -> (i32, i32, i32) {
    %c0_i32 = arith.constant 0 : i32
    %c0_i32_0 = arith.constant 0 : i32
    %c0_i32_1 = arith.constant 0 : i32
    return %arg0, %c0_i32, %c0_i32_0 : i32, i32, i32
  }
  func.func @transform_1(%arg0: i32) -> (i32, i32) {
    %c0_i32 = arith.constant 0 : i32
    %c0_i32_0 = arith.constant 0 : i32
    %c0_i32_1 = arith.constant 0 : i32
    return %c0_i32, %c0_i32_0 : i32, i32
  }
  func.func @transform_2(%arg0: i32) -> (i32, i32) {
    %c0_i32 = arith.constant 0 : i32
    %c0_i32_0 = arith.constant 0 : i32
    %c0_i32_1 = arith.constant 0 : i32
    return %c0_i32, %c0_i32_0 : i32, i32
  }
  func.func @transform_3(%arg0: i32) -> (i32, i32) {
    %c0_i32 = arith.constant 0 : i32
    %c0_i32_0 = arith.constant 0 : i32
    %c0_i32_1 = arith.constant 0 : i32
    return %c0_i32, %c0_i32_0 : i32, i32
  }
  func.func @transform_4(%arg0: i32) -> (i32, i32) {
    %c0_i32 = arith.constant 0 : i32
    %c0_i32_0 = arith.constant 0 : i32
    %c0_i32_1 = arith.constant 0 : i32
    return %c0_i32, %c0_i32_0 : i32, i32
  }
  func.func @transform_5(%arg0: i32) -> (i32, i32) {
    %c0_i32 = arith.constant 0 : i32
    %c0_i32_0 = arith.constant 0 : i32
    %c0_i32_1 = arith.constant 0 : i32
    return %c0_i32, %c0_i32_0 : i32, i32
  }
  func.func @transform_6(%arg0: i32) -> (i32, i32) {
    %c0_i32 = arith.constant 0 : i32
    %c0_i32_0 = arith.constant 0 : i32
    %c0_i32_1 = arith.constant 0 : i32
    return %c0_i32, %c0_i32_0 : i32, i32
  }
  func.func @transform_7(%arg0: i32) -> (i32, i32) {
    %c0_i32 = arith.constant 0 : i32
    %c0_i32_0 = arith.constant 0 : i32
    %c0_i32_1 = arith.constant 0 : i32
    return %c0_i32, %c0_i32_0 : i32, i32
  }
  func.func @transform_8(%arg0: i32) -> (i32, i32) {
    %c0_i32 = arith.constant 0 : i32
    %c0_i32_0 = arith.constant 0 : i32
    %c0_i32_1 = arith.constant 0 : i32
    return %c0_i32, %c0_i32_0 : i32, i32
  }
  func.func @transform_9(%arg0: i32) -> (i32, i32) {
    %c0_i32 = arith.constant 0 : i32
    %c0_i32_0 = arith.constant 0 : i32
    %c0_i32_1 = arith.constant 0 : i32
    return %c0_i32, %c0_i32_0 : i32, i32
  }
  func.func @transform_10(%arg0: i32) -> (i32, i32) {
    %c0_i32 = arith.constant 0 : i32
    %c0_i32_0 = arith.constant 0 : i32
    %c0_i32_1 = arith.constant 0 : i32
    return %c0_i32, %c0_i32_0 : i32, i32
  }
  func.func @transform_11(%arg0: i32) -> (i32, i32) {
    %c0_i32 = arith.constant 0 : i32
    %c0_i32_0 = arith.constant 0 : i32
    %c0_i32_1 = arith.constant 0 : i32
    return %c0_i32, %c0_i32_0 : i32, i32
  }
  func.func @transform_12(%arg0: i32) -> (i32, i32) {
    %c0_i32 = arith.constant 0 : i32
    %c0_i32_0 = arith.constant 0 : i32
    %c0_i32_1 = arith.constant 0 : i32
    return %c0_i32, %c0_i32_0 : i32, i32
  }
  func.func @transform_13(%arg0: i32) -> (i32, i32, i32) {
    %c0_i32 = arith.constant 0 : i32
    %c0_i32_0 = arith.constant 0 : i32
    %c0_i32_1 = arith.constant 0 : i32
    return %arg0, %c0_i32, %c0_i32_0 : i32, i32, i32
  }
}

</mosaic_0001>

<bundles_post_ra>
// kernel: tpu_custom_call.1
= control target key start
LH: loop header
LB: loop body
LE: loop exit
PB: predicated region body
PF: predicated region fallthrough
CT: control target
= control target key end

     0   :  { %s3159_s0 = inlined_call_operand.vmem [shape: f32[2,8,32], index: 0, kind: input, shape index: {}]   ;;  %s3160_s1 = inlined_call_operand.vmem [shape: f32[1,32], index: 1, kind: input, shape index: {}]   ;;  %s3161_s2 = inlined_call_operand.vmem [shape: f32[1,32], index: 2, kind: input, shape index: {}]   ;;  %s3162_s3 = inlined_call_operand.vmem [shape: bf16[32,96], index: 3, kind: input, shape index: {}]   ;;  %s3163_s4 = inlined_call_operand.vmem [shape: f32[1,96], index: 4, kind: input, shape index: {}]   ;;  %s3164_s5 = inlined_call_operand.vmem [shape: bf16[32,32], index: 5, kind: input, shape index: {}]   ;;  %s3165_s6 = inlined_call_operand.vmem [shape: f32[1,32], index: 6, kind: input, shape index: {}]   ;;  %s3166_s7 = inlined_call_operand.vmem [shape: f32[1,32], index: 7, kind: input, shape index: {}]   ;;  %s3167_s8 = inlined_call_operand.vmem [shape: f32[1,32], index: 8, kind: input, shape index: {}]   ;;  %s3168_s9 = inlined_call_operand.vmem [shape: bf16[32,128], index: 9, kind: input, shape index: {}]   ;;  %s3169_s10 = inlined_call_operand.vmem [shape: f32[1,128], index: 10, kind: input, shape index: {}]   ;;  %s3170_s11 = inlined_call_operand.vmem [shape: bf16[128,32], index: 11, kind: input, shape index: {}]   ;;  %s3171_s12 = inlined_call_operand.vmem [shape: f32[1,32], index: 12, kind: input, shape index: {}]   ;;  %s3172_s13 = inlined_call_operand.hbm [shape: f32[2,8,32], index: 13, kind: output, shape index: {}]  }
   0x1   :  { %3173 = sst [smem:[#allocation5_spill]] %s3159_s0 }
   0x2   :  { %3174 = sst [smem:[#allocation6_spill]] %s3160_s1 }
   0x3   :  { %3175 = sst [smem:[#allocation7_spill]] %s3161_s2 }
   0x4   :  { %3176 = sst [smem:[#allocation8_spill]] %s3162_s3 }
   0x5   :  { %18 = vsyncpa [#allocation3], 0 }
   0x6   :  { %20 = vsyncpa [#allocation3 + $0x1], 0  ;;  %s2723_s25 = smov 0   ;;  %s2725_s26 = smov 0  }
   0x7   :  { %s2727_s27 = smov 0   ;;  %s2729_s28 = smov 0  }
   0x8 LB: > { %s2744_s29 = sadd.s32 4294967295, %s2640_s28   ;;  %s2322_s30 = sadd.s32 4294967294, %s2640_s28   ;;  %s2640_s28 = sphi %s2729_s28, %s3186_s28   ;;  %s2636_s27 = sphi %s2727_s27, %s3185_s27   ;;  %s2632_s26 = sphi %s2725_s26, %s3184_s26   ;;  %s2628_s25 = sphi %s2723_s25, %s3183_s25  }
   0x9   : > { %s2748_s14 = sadd.s32 1, %s2640_s28   ;;  %s311_s15 = sadd.s32 1, %s2636_s27 }
   0xa   : > { %s308_s16 = ssub.s32 %s2640_s28, %s2748_s14  ;;  %p321_p0 = scmp.ne.s32.totalorder %s2636_s27, %s2632_s26 }
   0xb   : > { %p309_p1 = scmp.eq.s32.totalorder %s308_s16, 0  ;;  %p322_p2 = scmp.eq.s32.totalorder %s2744_s29, 1 }
   0xc   : > { %p327_p3 = scmp.ne.s32.totalorder %s2632_s26, %s2628_s25  ;;  %p328_p4 = scmp.eq.s32.totalorder %s2322_s30, 1 }
   0xd   : > { %s2759_s17 = scalar_select %p309_p1, %s2636_s27, %s311_s15  }
   0xe   : > { %p2761_p5 = por %p322_p2, %p321_p0  ;;  %p2765_p6 = por %p328_p4, %p327_p3 }
   0xf   : > { %p2325_p7 = scmp.ge.s32.totalorder %s2640_s28, 1  ;;  %p389_p8 = scmp.lt.s32.totalorder %s2640_s28, 3 }
  0x11   : > { %p390_p9 = pnand %p2325_p7, %p389_p8 }
  0x12   : > { %p432_p10 = scmp.lt.s32.totalorder (!%p390_p9), %s2744_s29, 1  ;;  %s3179_s0 = sld [smem:[#allocation5_spill]] (!%p390_p9) }
  0x13   : > { %393 = sbr.rel (%p390_p9) target bundleno = 2794 (0xaea), region = 72  ;;  %s3180_s3 = sld [smem:[#allocation8_spill]] (!%p390_p9) }
  0x14   : > { %s3181_s1 = sld [smem:[#allocation6_spill]] (!%p390_p9)  ;;  %s2645_s22 = smov (!%p390_p9), 104  }
  0x15   : > { %s3182_s2 = sld [smem:[#allocation7_spill]] (!%p390_p9)  ;;  %s2646_s23 = smov (!%p390_p9), 96  }
  0x16   : > { %s2649_s30 = smov (!%p390_p9), 64   ;;  %s2650_s15 = smov (!%p390_p9), 24  }
  0x17   : > { %s2651_s16 = smov (!%p390_p9), 16  }
  0x18   : > { %s433_s20 = scalar_select %p432_p10, %s2744_s29, 1  ;;  %vm440_vm0 = vcmask 261120   ;;  %v2642_v2 = vmov 32.0   ;;  %v2549_v32 = vld [vmem:[%s3163_s4] ss:$0 sm:$0xff]  ;;  %vm526_vm5 = vcmask 1047556  }
  0x19   : > { %2555 = vrcp.f32 %v2642_v2  ;;  %v2400_v14 = vld [vmem:[%s3180_s3 + $0x8] sm:$0xff]  ;;  %v2399_v15 = vld [vmem:[%s3180_s3] sm:$0xff]  ;;  %v2647_v44 = vmov 1983009808   ;;  %v2648_v52 = vmov 1934713408  }
  0x1a   : > { %s2327_s21 = sshll.u32 %s433_s20, 3  ;;  %508 = vmatpush.bf16.msra.mxu0 %v2400_v14  ;;  %v2547_v25 = vld [vmem:[%s3181_s1] ss:$0 sm:$0xff]  ;;  %s2643_s20 = smov 112   ;;  %v531_v45 = vunpack.c.l.s4 %v2647_v44  ;;  %v555_v53 = vunpack.c.l.s4 %v2648_v52  ;;  %vm1195_vm6 = vcmask 1043456   ;;  %vm1191_vm7 = vcmask 64512  }
  0x1b   : > { %s2776_s24 = scalar_lea.vmem %s3179_s0, %s2327_s21  ;;  %v2548_v28 = vld [vmem:[%s3182_s2] ss:$0 sm:$0xff]  ;;  %s2644_s21 = smov 120   ;;  %vm2051_vm9 = vcmask 130048   ;;  %vm2053_vm10 = vcmask 195584  }
  0x1c   : > { %v437_v0 = vld [vmem:[%s2776_s24] sm:$0xff]  ;;  %v2822_v51 = vunpack.c.0.s8 %v531_v45 }
  0x1d   : > { %v441_v1 = vsel %vm440_vm0, %v437_v0, 0.0 }
  0x1e   : > { %442 = vadd.xlane.f32.xlu0 %v441_v1  ;;  %509 = vmatpush.bf16.msra.mxu0 %v2399_v15  ;;  %v2831_v1 = vunpack.c.0.s8 %v555_v53 }
  0x1f   : > { %v2556_v3 = vpop.eup %2555 }
  0x20   : > { %v445_v4 = vmul.f32 32.0, %v2556_v3  ;;  %vm449_vm1 = vweird.f32 %v2556_v3 }
  0x22   : > { %v446_v5 = vsub.f32 1.0, %v445_v4 }
  0x24   : > { %v447_v6 = vmul.f32 %v2556_v3, %v446_v5 }
  0x26   : > { %v448_v7 = vadd.f32 %v2556_v3, %v447_v6 }
  0x28   : > { %v2780_v8 = vsel %vm449_vm1, %v2556_v3, %v448_v7 }
  0x91   : > { %v443_v9 = vpop.xlane.xlu0 %442 }
  0x92   : > { %v451_v10 = vmul.f32 %v2780_v8, %v443_v9 }
  0x94   : > { %v452_v11 = vsub.f32 %v437_v0, %v451_v10 }
  0x96   : > { %v453_v12 = vmul.f32 %v452_v11, %v452_v11 }
  0x98   : > { %v454_v13 = vsel %vm440_vm0, %v453_v12, 0.0 }
  0x99   : > { %455 = vadd.xlane.f32.xlu0 %v454_v13 }
 0x10c   : > { %v456_v16 = vpop.xlane.xlu0 %455 }
 0x10d   : > { %v457_v17 = vmul.f32 %v456_v16, %v2780_v8 }
 0x10f   : > { %v458_v18 = vadd.f32 1e-05, %v457_v17 }
 0x111   : > { %2557 = vrsqrt.f32 %v458_v18  ;;  %vm465_vm3 = vweird.f32 %v458_v18 }
 0x117   : > { %v2558_v19 = vpop.eup %2557 }
 0x118   : > { %v460_v20 = vmul.f32 %v2558_v19, %v458_v18  ;;  %vm466_vm2 = vweird.f32 %v2558_v19 }
 0x119   : > { %vm467_vm4 = vmor %vm465_vm3, %vm466_vm2 }
 0x11a   : > { %v461_v21 = vmul.f32 %v2558_v19, %v460_v20 }
 0x11c   : > { %v462_v22 = vmul.f32 0.5, %v461_v21 }
 0x11e   : > { %v463_v23 = vsub.f32 1.5, %v462_v22 }
 0x120   : > { %v464_v24 = vmul.f32 %v2558_v19, %v463_v23 }
 0x122   : > { %v468_v26 = vsel %vm467_vm4, %v2558_v19, %v464_v24 }
 0x123   : > { %v469_v27 = vmul.f32 %v468_v26, %v452_v11 }
 0x125   : > { %v473_v29 = vmul.f32 %v2547_v25, %v469_v27 }
 0x127   : > { %v477_v30 = vadd.f32 %v2548_v28, %v473_v29 }
 0x129   : > { %v478_v31 = vpack.c.bf16 %v477_v30, %v477_v30 }
 0x12b   : > { %2336 = vmatmul.msk.bf16.vlgmr.msra.gmra.mxu0 %vm440_vm0, %v478_v31 }
 0x1a8   : > { %v511_v33 = vpop.f32.mrf.mxu0 }
 0x1a9   : > { %v2801_v34 = vadd.f32 %v2549_v32, %v511_v33 }
 0x1ab   : > { %519 = vrot.lane.b32.xlu2 %v2801_v34, %s2643_s20  ;;  %516 = vrot.lane.b32.xlu1 %v2801_v34, %s2644_s21  ;;  %s2652_s20 = smov 8  }
 0x1b0   : > { %v513_v35 = vpop.f32.mrf.mxu0 }
 0x1b3   : > { %522 = vrot.lane.b32.xlu1 %v2801_v34, %s2645_s22 }
 0x205   : > { %v2813_v38 = vpop.permute.xlu2 %519 }
 0x21d   : > { %v2806_v36 = vpop.permute.xlu1 %516 }
 0x21e   : > { %v2810_v37 = vpack.i.bf16 %v2801_v34, %v2806_v36 }
 0x220   : > { %2466 = vrot.lane.b32.xlu2 %v2810_v37, %s2646_s23 }
 0x225   : > { %v2815_v39 = vpop.permute.xlu1 %522 }
 0x226   : > { %v2819_v40 = vpack.i.bf16 %v2813_v38, %v2815_v39 }
 0x228   : > { %2471 = vrot.lane.b32.xlu0 %v2819_v40, %s2646_s23  ;;  %s2396_s23 = sshll.u32 %s2744_s29, 3 }
 0x229   : > { %s2258_s1 = scalar_lea.hbm %s3172_s13, %s2396_s23 }
 0x22a   : > { %s2262_s2 = sshll.u32 %s2258_s1, 4  ;;  %s2263_s2 = int_to_ptr.hbm [resolvable:$true] %s2262_s2 }
 0x22b   : > { %s2592_s3 = sshra.s32 %s2263_s2, 4  ;;  %s2593_s3 = int_to_ptr.hbm [resolvable:$true] %s2592_s3 }
 0x22c   : > { %s2594_s0 = scalar_lea.hbm %s2593_s3, 8  ;;  %p2599_p0 = scmp.lt.s32.totalorder %s2593_s3, %s3172_s13 }
 0x22d   : > { %p2595_p11 = scmp.ne.s32.totalorder %s2593_s3, %s2594_s0 }
 0x22f   : > { %p2596_p12 = pnand %p2595_p11, %p2761_p5 }
 0x231   : > { %p2597_p13 = pneg %p2596_p12 }
 0x27a   : > { %v2467_v41 = vpop.permute.xlu2 %2466 }
 0x27b   : > { %v2469_v42 = vunpack.i.h.bf16 %v2467_v41  ;;  %v2468_v43 = vunpack.i.l.bf16 %v2467_v41 }
 0x27d   : > { %v604_v47 = vrot.slane %v2469_v42, 4  ;;  %v616_v48 = vrot.slane %v2468_v43, 4 }
 0x29a   : > { %v2472_v46 = vpop.permute.xlu0 %2471 }
 0x29b   : > { %v2474_v49 = vunpack.i.h.bf16 %v2472_v46  ;;  %v2473_v50 = vunpack.i.l.bf16 %v2472_v46 }
 0x29d   : > { %v602_v54 = vrot.slane %v2474_v49, 4  ;;  %v605_v55 = vsel %vm526_vm5, %v2474_v49, %v604_v47  ;;  %v614_v56 = vrot.slane %v2473_v50, 4  ;;  %v617_v57 = vsel %vm526_vm5, %v2473_v50, %v616_v48 }
 0x29e   : > { %v613_v58 = vperm.slane %v605_v55, %v2822_v51  ;;  %v625_v59 = vperm.slane %v617_v57, %v2822_v51 }
 0x29f   : > { %v603_v60 = vsel %vm526_vm5, %v602_v54, %v2469_v42  ;;  %v615_v61 = vsel %vm526_vm5, %v614_v56, %v2468_v43 }
 0x2a0   : > { %v640_v62 = vrot.slane %v613_v58, 4  ;;  %v621_v63 = vperm.slane %v615_v61, %v2822_v51  ;;  %v638_v0 = vrot.slane %v625_v59, 4  ;;  %v609_v2 = vperm.slane %v603_v60, %v2822_v51 }
 0x2a2   : > { %v626_v3 = vrot.slane %v621_v63, 4  ;;  %v641_v4 = vsel %vm526_vm5, %v625_v59, %v640_v62  ;;  %v639_v5 = vsel %vm526_vm5, %v638_v0, %v613_v58  ;;  %v628_v19 = vrot.slane %v609_v2, 4 }
 0x2a3   : > { %v649_v6 = vperm.slane %v641_v4, %v2831_v1  ;;  %v645_v7 = vperm.slane %v639_v5, %v2831_v1 }
 0x2a4   : > { %v627_v9 = vsel %vm526_vm5, %v626_v3, %v609_v2  ;;  %v629_v24 = vsel %vm526_vm5, %v621_v63, %v628_v19 }
 0x2a5   : > { %v656_v10 = vrot.slane %v649_v6, 4  ;;  %v654_v11 = vrot.slane %v645_v7, 4  ;;  %v633_v12 = vperm.slane %v627_v9, %v2831_v1  ;;  %v664_v15 = vpack.c.bf16 %v649_v6, %v649_v6 }
 0x2a6   : > { %v662_v20 = vpack.c.bf16 %v645_v7, %v645_v7  ;;  %v637_v25 = vperm.slane %v629_v24, %v2831_v1 }
 0x2a7   : > { %v657_v13 = vsel %vm526_vm5, 0.0, %v656_v10  ;;  %v655_v14 = vsel %vm526_vm5, 0.0, %v654_v11  ;;  %v650_v18 = vrot.slane %v633_v12, 4  ;;  %v658_v22 = vpack.c.bf16 %v633_v12, %v633_v12 }
 0x2a8   : > { %v665_v16 = vpack.c.bf16 %v657_v13, %v657_v13  ;;  %v663_v17 = vpack.c.bf16 %v655_v14, %v655_v14  ;;  %v652_v26 = vrot.slane %v637_v25, 4  ;;  %v660_v28 = vpack.c.bf16 %v637_v25, %v637_v25 }
 0x2a9   : > { %v651_v21 = vsel %vm526_vm5, 0.0, %v650_v18 }
 0x2aa   : > { %2478 = vxpose.binary.xlu0.c.b16.start.end [1/2] (short) (narrow) %v665_v16, %v664_v15, 16  ;;  %v659_v23 = vpack.c.bf16 %v651_v21, %v651_v21  ;;  %v653_v27 = vsel %vm526_vm5, 0.0, %v652_v26 }
 0x2ab   : > { %2475 = vxpose.binary.xlu1.c.b16.start.end [1/2] (short) (narrow) %v663_v17, %v662_v20, 16  ;;  %v661_v29 = vpack.c.bf16 %v653_v27, %v653_v27 }
 0x2ac   : > { %2481 = vxpose.binary.xlu2.c.b16.start.end [1/2] (short) (narrow) %v659_v23, %v658_v22, 16 }
 0x2bc   : > { %2484 = vxpose.binary.xlu2.c.b16.start.end [1/2] (short) (narrow) %v661_v29, %v660_v28, 16 }
 0x34d   : > { %v2482_v30 = vpop.trf.xlu2 }
 0x355   : > { %v2483_v31 = vpop.trf.xlu2 }
 0x356   : > { %v2479_v32 = vpop.trf.xlu0 }
 0x357   : > { %v2476_v33 = vpop.trf.xlu1  ;;  %v929_v42 = vrot.slane %v2479_v32, 4  ;;  %v525_v32 = vrot.slane %v2813_v38, 4 }
 0x358   : > { %v923_v35 = vrot.slane %v2476_v33, 4 }
 0x35a   : > { %v924_v41 = vsel %vm526_vm5, %v923_v35, %v2482_v30  ;;  %v540_v35 = vrot.slane %v2806_v36, 4 }
 0x35b   : > { %v928_v43 = vperm.slane %v924_v41, %v2822_v51  ;;  %v538_v41 = vrot.slane %v2815_v39, 4 }
 0x35d   : > { %v2485_v44 = vpop.trf.xlu2  ;;  %v937_v47 = vrot.slane %v928_v43, 4 }
 0x35e   : > { %v930_v45 = vsel %vm526_vm5, %v929_v42, %v2485_v44  ;;  %v2480_v50 = vpop.trf.xlu0  ;;  %v541_v42 = vsel %vm526_vm5, %v2815_v39, %v540_v35  ;;  %v539_v44 = vsel %vm526_vm5, %v538_v41, %v2806_v36 }
 0x35f   : > { %v2477_v46 = vpop.trf.xlu1  ;;  %v934_v48 = vperm.slane %v930_v45, %v2822_v51  ;;  %v957_v55 = vrot.slane %v2480_v50, 4 }
 0x360   : > { %v951_v49 = vrot.slane %v2477_v46, 4  ;;  %v545_v46 = vperm.slane %v539_v44, %v2822_v51 }
 0x361   : > { %v935_v52 = vrot.slane %v934_v48, 4  ;;  %v938_v53 = vsel %vm526_vm5, %v934_v48, %v937_v47 }
 0x362   : > { %v952_v54 = vsel %vm526_vm5, %v951_v49, %v2483_v31  ;;  %v946_v58 = vperm.slane %v938_v53, %v2831_v1  ;;  %v528_v31 = vrot.slane %v2801_v34, 4  ;;  %v550_v50 = vrot.slane %v545_v46, 4 }
 0x363   : > { %v936_v56 = vsel %vm526_vm5, %v935_v52, %v928_v43  ;;  %v956_v57 = vperm.slane %v952_v54, %v2822_v51 }
 0x364   : > { %v942_v59 = vperm.slane %v936_v56, %v2831_v1  ;;  %v949_v0 = vrot.slane %v946_v58, 4  ;;  %v999_v7 = vshrl.u32 %v946_v58, 16  ;;  %v529_v33 = vsel %vm526_vm5, %v2813_v38, %v528_v31 }
 0x365   : > { %v2486_v60 = vpop.trf.xlu2  ;;  %v965_v62 = vrot.slane %v956_v57, 4  ;;  %v537_v43 = vperm.slane %v529_v33, %v2822_v51 }
 0x366   : > { %v958_v61 = vsel %vm526_vm5, %v957_v55, %v2486_v60  ;;  %v947_v4 = vrot.slane %v942_v59, 4  ;;  %v950_v11 = vsel %vm526_vm5, 0, %v949_v0  ;;  %v983_v28 = vshrl.u32 %v942_v59, 16 }
 0x367   : > { %v962_v63 = vperm.slane %v958_v61, %v2822_v51  ;;  %v1007_v18 = vshrl.u32 %v950_v11, 16  ;;  %v564_v38 = vrot.slane %v537_v43, 4 }
 0x368   : > { %v948_v13 = vsel %vm526_vm5, 0, %v947_v4 }
 0x369   : > { %v963_v2 = vrot.slane %v962_v63, 4  ;;  %v966_v3 = vsel %vm526_vm5, %v962_v63, %v965_v62  ;;  %v991_v23 = vshrl.u32 %v948_v13, 16 }
 0x36a   : > { %v974_v5 = vperm.slane %v966_v3, %v2831_v1 }
 0x36b   : > { %v964_v6 = vsel %vm526_vm5, %v963_v2, %v956_v57 }
 0x36c   : > { %v970_v9 = vperm.slane %v964_v6, %v2831_v1  ;;  %v1000_v10 = vshrl.u32 %v974_v5, 16  ;;  %v977_v12 = vrot.slane %v974_v5, 4  ;;  %v997_v14 = vpack.i.b16 %v974_v5, %v946_v58 }
 0x36e   : > { %v1001_v15 = vpack.i.b16 %v1000_v10, %v999_v7  ;;  %v978_v16 = vsel %vm526_vm5, 0, %v977_v12  ;;  %v975_v17 = vrot.slane %v970_v9, 4  ;;  %v984_v27 = vshrl.u32 %v970_v9, 16 }
 0x36f   : > { %v1008_v19 = vshrl.u32 %v978_v16, 16  ;;  %v1005_v21 = vpack.i.b16 %v978_v16, %v950_v11  ;;  %v981_v29 = vpack.i.b16 %v970_v9, %v942_v59 }
 0x370   : > { %2487 = vxpose.binary.xlu2.c.b16.start.end [1/2] (short) (narrow) %v1001_v15, %v997_v14, 16  ;;  %v976_v20 = vsel %vm526_vm5, 0, %v975_v17  ;;  %v985_v30 = vpack.i.b16 %v984_v27, %v983_v28 }
 0x371   : > { %v1009_v22 = vpack.i.b16 %v1008_v19, %v1007_v18  ;;  %v992_v24 = vshrl.u32 %v976_v20, 16  ;;  %v989_v25 = vpack.i.b16 %v976_v20, %v948_v13 }
 0x373   : > { %2493 = vxpose.binary.xlu1.c.b16.start.end [1/2] (short) (narrow) %v1009_v22, %v1005_v21, 16  ;;  %v993_v26 = vpack.i.b16 %v992_v24, %v991_v23 }
 0x375   : > { %2490 = vxpose.binary.xlu0.c.b16.start.end [1/2] (short) (narrow) %v993_v26, %v989_v25, 16 }
 0x383   : > { %2496 = vxpose.binary.xlu1.c.b16.start.end [1/2] (short) (narrow) %v985_v30, %v981_v29, 16 }
 0x3d9   : > { %2505 = vrot.lane.b32.xlu2 %v2819_v40, %s2649_s30  ;;  %v527_v40 = vsel %vm526_vm5, %v525_v32, %v2801_v34 }
 0x3da   : > { %v533_v45 = vperm.slane %v527_v40, %v2822_v51 }
 0x3dc   : > { %v552_v49 = vrot.slane %v533_v45, 4  ;;  %v551_v55 = vsel %vm526_vm5, %v550_v50, %v533_v45 }
 0x3dd   : > { %v557_v57 = vperm.slane %v551_v55, %v2831_v1 }
 0x3de   : > { %v553_v52 = vsel %vm526_vm5, %v545_v46, %v552_v49 }
 0x3df   : > { %v561_v53 = vperm.slane %v553_v52, %v2831_v1  ;;  %v574_v62 = vrot.slane %v557_v57, 4  ;;  %v582_v22 = vpack.c.bf16 %v557_v57, %v557_v57 }
 0x3e1   : > { %v576_v58 = vrot.slane %v561_v53, 4  ;;  %v575_v10 = vsel %vm526_vm5, 0.0, %v574_v62  ;;  %v584_v11 = vpack.c.bf16 %v561_v53, %v561_v53 }
 0x3e2   : > { %v583_v17 = vpack.c.bf16 %v575_v10, %v575_v10 }
 0x3e3   : > { %2500 = vrot.lane.b32.xlu0 %v2810_v37, %s2649_s30  ;;  %v549_v37 = vperm.slane %v541_v42, %v2822_v51  ;;  %v577_v0 = vsel %vm526_vm5, 0.0, %v576_v58 }
 0x3e4   : > { %v585_v9 = vpack.c.bf16 %v577_v0, %v577_v0 }
 0x3e5   : > { %v562_v47 = vrot.slane %v549_v37, 4  ;;  %v565_v48 = vsel %vm526_vm5, %v549_v37, %v564_v38 }
 0x3e6   : > { %v573_v39 = vperm.slane %v565_v48, %v2831_v1 }
 0x3e7   : > { %v563_v34 = vsel %vm526_vm5, %v562_v47, %v537_v43 }
 0x3e8   : > { %v569_v36 = vperm.slane %v563_v34, %v2831_v1  ;;  %v580_v54 = vrot.slane %v573_v39, 4  ;;  %v588_v2 = vpack.c.bf16 %v573_v39, %v573_v39 }
 0x3ea   : > { %v578_v59 = vrot.slane %v569_v36, 4  ;;  %v581_v60 = vsel %vm526_vm5, 0.0, %v580_v54  ;;  %v586_v12 = vpack.c.bf16 %v569_v36, %v569_v36  ;;  %v749_v13 = vrot.slane %v588_v2, 4 }
 0x3eb   : > { %v589_v61 = vpack.c.bf16 %v581_v60, %v581_v60 }
 0x3ec   : > { %v579_v63 = vsel %vm526_vm5, 0.0, %v578_v59  ;;  %v742_v20 = vrot.slane %v586_v12, 4  ;;  %v750_v23 = vsel %vm526_vm5, %v749_v13, %v584_v11 }
 0x3ed   : > { %v587_v5 = vpack.c.bf16 %v579_v63, %v579_v63  ;;  %v769_v6 = vrot.slane %v589_v61, 4  ;;  %v754_v30 = vperm.slane %v750_v23, %v2822_v51 }
 0x3ee   : > { %v744_v33 = vsel %vm526_vm5, %v742_v20, %v582_v22 }
 0x3ef   : > { %v763_v16 = vrot.slane %v587_v5, 4  ;;  %v770_v18 = vsel %vm526_vm5, %v769_v6, %v585_v9  ;;  %v748_v44 = vperm.slane %v744_v33, %v2822_v51  ;;  %v755_v45 = vrot.slane %v754_v30, 4 }
 0x3f0   : > { %v774_v25 = vperm.slane %v770_v18, %v2822_v51 }
 0x3f1   : > { %v764_v28 = vsel %vm526_vm5, %v763_v16, %v583_v17  ;;  %v756_v39 = vsel %vm526_vm5, %v755_v45, %v748_v44 }
 0x3f2   : > { %v768_v41 = vperm.slane %v764_v28, %v2822_v51  ;;  %v775_v42 = vrot.slane %v774_v25, 4  ;;  %v760_v54 = vperm.slane %v756_v39, %v2831_v1 }
 0x3f4   : > { %v776_v47 = vsel %vm526_vm5, %v775_v42, %v768_v41  ;;  %v761_v62 = vrot.slane %v760_v54, 4  ;;  %v786_v10 = vshrl.u32 %v760_v54, 16 }
 0x3f5   : > { %v780_v34 = vperm.slane %v776_v47, %v2831_v1 }
 0x3f7   : > { %v781_v57 = vrot.slane %v780_v34, 4  ;;  %v785_v9 = vpack.i.b16 %v780_v34, %v760_v54 }
 0x3f9   : > { %v782_v11 = vsel %vm526_vm5, 0, %v781_v57 }
 0x3fa   : > { %v793_v18 = vshrl.u32 %v782_v11, 16 }
 0x411   : > { %v2488_v14 = vpop.trf.xlu2 }
 0x412   : > { %v1139_v19 = vrot.slane %v2488_v14, 4 }
 0x419   : > { %v2489_v43 = vpop.trf.xlu2 }
 0x41a   : > { %v1159_v37 = vrot.slane %v2489_v43, 4 }
 0x41f   : > { %v2494_v56 = vpop.trf.xlu1 }
 0x420   : > { %v1145_v4 = vrot.slane %v2494_v56, 4 }
 0x421   : > { %v2491_v3 = vpop.trf.xlu0 }
 0x422   : > { %v1146_v15 = vsel %vm526_vm5, %v1145_v4, %v2491_v3  ;;  %v787_v3 = vshrl.u32 %v780_v34, 16 }
 0x423   : > { %v1150_v21 = vperm.slane %v1146_v15, %v2822_v51  ;;  %v762_v15 = vsel %vm526_vm5, 0, %v761_v62 }
 0x424   : > { %v788_v14 = vpack.i.b16 %v787_v3, %v786_v10  ;;  %v791_v17 = vpack.i.b16 %v782_v11, %v762_v15  ;;  %v792_v20 = vshrl.u32 %v762_v15, 16 }
 0x425   : > { %v1151_v31 = vrot.slane %v1150_v21, 4 }
 0x426   : > { %v794_v23 = vpack.i.b16 %v793_v18, %v792_v20 }
 0x427   : > { %v2495_v7 = vpop.trf.xlu1 }
 0x428   : > { %v1165_v24 = vrot.slane %v2495_v7, 4 }
 0x429   : > { %v2492_v26 = vpop.trf.xlu0 }
 0x42a   : > { %v1166_v35 = vsel %vm526_vm5, %v1165_v24, %v2492_v26 }
 0x42b   : > { %v1170_v38 = vperm.slane %v1166_v35, %v2822_v51 }
 0x42d   : > { %v1171_v50 = vrot.slane %v1170_v38, 4 }
 0x42f   : > { %v2497_v27 = vpop.trf.xlu1 }
 0x430   : > { %v1140_v29 = vsel %vm526_vm5, %v1139_v19, %v2497_v27 }
 0x431   : > { %v1144_v32 = vperm.slane %v1140_v29, %v2822_v51 }
 0x433   : > { %v1152_v40 = vsel %vm526_vm5, %v1151_v31, %v1144_v32  ;;  %v2506_v19 = vpop.permute.xlu2 %2505 }
 0x434   : > { %v1156_v46 = vperm.slane %v1152_v40, %v2831_v1  ;;  %v2508_v21 = vunpack.i.h.bf16 %v2506_v19  ;;  %v2507_v22 = vunpack.i.l.bf16 %v2506_v19 }
 0x436   : > { %v1157_v53 = vrot.slane %v1156_v46, 4  ;;  %v1182_v56 = vshrl.u32 %v1156_v46, 16  ;;  %v678_v25 = vrot.slane %v2508_v21, 4  ;;  %v690_v26 = vrot.slane %v2507_v22, 4 }
 0x437   : > { %v2498_v48 = vpop.trf.xlu1 }
 0x438   : > { %v1160_v49 = vsel %vm526_vm5, %v1159_v37, %v2498_v48  ;;  %v1158_v60 = vsel %vm526_vm5, 0, %v1157_v53 }
 0x439   : > { %v1164_v52 = vperm.slane %v1160_v49, %v2822_v51  ;;  %v1188_v5 = vshrl.u32 %v1158_v60, 16 }
 0x43b   : > { %v1172_v36 = vsel %vm526_vm5, %v1171_v50, %v1164_v52 }
 0x43c   : > { %v1176_v55 = vperm.slane %v1172_v36, %v2831_v1 }
 0x43e   : > { %v1181_v58 = vpack.i.b16 %v1176_v55, %v1156_v46  ;;  %v1183_v59 = vshrl.u32 %v1176_v55, 16  ;;  %v1177_v61 = vrot.slane %v1176_v55, 4 }
 0x440   : > { %v1197_v63 = vsel %vm1195_vm6, %v1181_v58, 0  ;;  %v1184_v0 = vpack.i.b16 %v1183_v59, %v1182_v56  ;;  %v1178_v2 = vsel %vm526_vm5, 0, %v1177_v61  ;;  %v1269_v58 = vlaneseq }
 0x441   : > { %1206 = vmatpush.bf16.msra.mxu1 %v1197_v63  ;;  %v1187_v4 = vpack.i.b16 %v1178_v2, %v1158_v60  ;;  %v1189_v6 = vshrl.u32 %v1178_v2, 16 }
 0x442   : > { %v1216_v7 = vsel %vm1195_vm6, %v1184_v0, 0  ;;  %v1270_v59 = vshrl.u32 %v1269_v58, 7  ;;  %v1272_v60 = vand.u32 127, %v1269_v58 }
 0x443   : > { %1225 = vmatpush.bf16.msra.mxu2 %v1216_v7  ;;  %v1235_v12 = vsel %vm1195_vm6, %v1187_v4, 0  ;;  %v1190_v13 = vpack.i.b16 %v1189_v6, %v1188_v5 }
 0x444   : > { %2337 = vmatmul.msk.bf16.vlgmr.msra.gmra.mxu1 %vm1191_vm7, %v785_v9  ;;  %1244 = vmatpush.bf16.msra.mxu3 %v1235_v12  ;;  %vm1273_vm8 = vcmp.le.s32.totalorder %v1272_v60, %v1270_v59 }
 0x445   : > { %v1254_v16 = vsel %vm1195_vm6, %v1190_v13, 0 }
 0x446   : > { %2338 = vmatmul.msk.bf16.vlgmr.msra.gmra.mxu2 %vm1191_vm7, %v788_v14  ;;  %1263 = vmatpush.bf16.msrb.mxu1 %v1254_v16 }
 0x447   : > { %2339 = vmatmul.msk.bf16.vlgmr.msra.gmra.mxu3 %vm1191_vm7, %v791_v17 }
 0x454   : > { %2340 = vmatmul.msk.bf16.vlgmr.msrb.gmra.mxu1 %vm1191_vm7, %v794_v23 }
 0x455   : > { %v2501_v24 = vpop.permute.xlu0 %2500 }
 0x456   : > { %v2503_v27 = vunpack.i.h.bf16 %v2501_v24  ;;  %v2502_v28 = vunpack.i.l.bf16 %v2501_v24 }
 0x458   : > { %v679_v29 = vsel %vm526_vm5, %v678_v25, %v2503_v27  ;;  %v680_v30 = vrot.slane %v2503_v27, 4  ;;  %v691_v31 = vsel %vm526_vm5, %v690_v26, %v2502_v28  ;;  %v692_v32 = vrot.slane %v2502_v28, 4 }
 0x459   : > { %v697_v33 = vperm.slane %v691_v31, %v2822_v51  ;;  %v685_v42 = vperm.slane %v679_v29, %v2822_v51 }
 0x45a   : > { %v681_v35 = vsel %vm526_vm5, %v2508_v21, %v680_v30  ;;  %v693_v41 = vsel %vm526_vm5, %v2507_v22, %v692_v32 }
 0x45b   : > { %v689_v43 = vperm.slane %v681_v35, %v2822_v51  ;;  %v701_v40 = vperm.slane %v693_v41, %v2822_v51  ;;  %v702_v37 = vrot.slane %v697_v33, 4  ;;  %v704_v39 = vrot.slane %v685_v42, 4 }
 0x45d   : > { %v716_v44 = vrot.slane %v689_v43, 4  ;;  %v714_v45 = vrot.slane %v701_v40, 4  ;;  %v703_v38 = vsel %vm526_vm5, %v702_v37, %v685_v42  ;;  %v705_v53 = vsel %vm526_vm5, %v697_v33, %v704_v39 }
 0x45e   : > { %v713_v36 = vperm.slane %v705_v53, %v2831_v1  ;;  %v709_v15 = vperm.slane %v703_v38, %v2831_v1 }
 0x45f   : > { %v715_v46 = vsel %vm526_vm5, %v714_v45, %v689_v43  ;;  %v717_v47 = vsel %vm526_vm5, %v701_v40, %v716_v44 }
 0x460   : > { %v721_v48 = vperm.slane %v715_v46, %v2831_v1  ;;  %v728_v54 = vrot.slane %v713_v36, 4  ;;  %v736_v56 = vpack.c.bf16 %v713_v36, %v713_v36  ;;  %v726_v16 = vrot.slane %v709_v15, 4 }
 0x461   : > { %v725_v18 = vperm.slane %v717_v47, %v2831_v1  ;;  %v734_v19 = vpack.c.bf16 %v709_v15, %v709_v15 }
 0x462   : > { %v730_v49 = vrot.slane %v721_v48, 4  ;;  %v738_v52 = vpack.c.bf16 %v721_v48, %v721_v48  ;;  %v729_v55 = vsel %vm526_vm5, 0.0, %v728_v54  ;;  %v727_v17 = vsel %vm526_vm5, 0.0, %v726_v16 }
 0x463   : > { %v737_v57 = vpack.c.bf16 %v729_v55, %v729_v55  ;;  %v735_v20 = vpack.c.bf16 %v727_v17, %v727_v17  ;;  %v732_v21 = vrot.slane %v725_v18, 4  ;;  %v740_v23 = vpack.c.bf16 %v725_v18, %v725_v18 }
 0x464   : > { %v731_v50 = vsel %vm526_vm5, 0.0, %v730_v49 }
 0x465   : > { %v739_v34 = vpack.c.bf16 %v731_v50, %v731_v50  ;;  %v733_v22 = vsel %vm526_vm5, 0.0, %v732_v21 }
 0x466   : > { %v741_v24 = vpack.c.bf16 %v733_v22, %v733_v22 }
 0x467   : > { %2509 = vxpose.binary.xlu1.c.b16.start.end [1/2] (short) (narrow) %v739_v34, %v738_v52, 16 }
 0x477   : > { %2518 = vxpose.binary.xlu1.c.b16.start.end [1/2] (short) (narrow) %v737_v57, %v736_v56, 16 }
 0x4c1   : > { %v1208_v61 = vpop.f32.mrf.mxu1 }
 0x4c2   : > { %v1276_v62 = vsel %vm1273_vm8, %v1208_v61, -1e+30 }
 0x4c3   : > { %v1280_v63 = vsel %vm1191_vm7, %v1276_v62, -inf }
 0x4c4   : > { %1281 = vmax.xlane.f32.xlu2 %v1280_v63 }
 0x4c9   : > { %v1210_v0 = vpop.f32.mrf.mxu1  ;;  %v1227_v2 = vpop.f32.mrf.mxu2 }
 0x4ca   : > { %v1277_v3 = vsel %vm1273_vm8, %v1227_v2, -1e+30  ;;  %v1246_v4 = vpop.f32.mrf.mxu3 }
 0x4cb   : > { %v1283_v5 = vsel %vm1191_vm7, %v1277_v3, -inf  ;;  %v1278_v10 = vsel %vm1273_vm8, %v1246_v4, -1e+30 }
 0x4cc   : > { %1284 = vmax.xlane.f32.xlu0 %v1283_v5  ;;  %v1286_v11 = vsel %vm1191_vm7, %v1278_v10, -inf }
 0x4d1   : > { %v1229_v6 = vpop.f32.mrf.mxu2  ;;  %v1265_v7 = vpop.f32.mrf.mxu1 }
 0x4d2   : > { %v1248_v9 = vpop.f32.mrf.mxu3  ;;  %v1279_v13 = vsel %vm1273_vm8, %v1265_v7, -1e+30 }
 0x4d3   : > { %v1289_v14 = vsel %vm1191_vm7, %v1279_v13, -inf }
 0x4d7   : > { %1287 = vmax.xlane.f32.xlu1 %v1286_v11 }
 0x4d9   : > { %v1267_v12 = vpop.f32.mrf.mxu1 }
 0x4df   : > { %1290 = vmax.xlane.f32.xlu1 %v1289_v14 }
 0x4ed   : > { %2512 = vxpose.binary.xlu2.c.b16.start.end [1/2] (short) (narrow) %v735_v20, %v734_v19, 16 }
 0x4f5   : > { %2515 = vxpose.binary.xlu0.c.b16.start.end [1/2] (short) (narrow) %v741_v24, %v740_v23, 16 }
 0x513   : > { %v2510_v25 = vpop.trf.xlu1 }
 0x514   : > { %v1456_v34 = vrot.slane %v2510_v25, 4 }
 0x51b   : > { %v2511_v26 = vpop.trf.xlu1 }
 0x51c   : > { %v1484_v57 = vrot.slane %v2511_v26, 4 }
 0x523   : > { %v2519_v27 = vpop.trf.xlu1 }
 0x52b   : > { %v2520_v30 = vpop.trf.xlu1 }
 0x537   : > { %v1282_v43 = vpop.xlane.xlu2 %1281 }
 0x538   : > { %v1292_v44 = vsub.f32 %v1276_v62, %v1282_v43 }
 0x53a   : > { %v1296_v38 = vmul.f32 1.442695, %v1292_v44 }
 0x53f   : > { %v1285_v28 = vpop.xlane.xlu0 %1284 }
 0x540   : > { %v1293_v29 = vsub.f32 %v1277_v3, %v1285_v28 }
 0x542   : > { %v1298_v31 = vmul.f32 1.442695, %v1293_v29 }
 0x544   : > { %2559 = vpow2.f32 %v1298_v31 }
 0x54a   : > { %v2960_v32 = vpop.eup %2559  ;;  %v1288_v33 = vpop.xlane.xlu1 %1287 }
 0x54b   : > { %v1307_v35 = vsel %vm1191_vm7, %v2960_v32, 0.0  ;;  %v1294_v41 = vsub.f32 %v1278_v10, %v1288_v33 }
 0x54c   : > { %1308 = vadd.xlane.f32.xlu1 %v1307_v35 }
 0x54d   : > { %v1300_v42 = vmul.f32 1.442695, %v1294_v41 }
 0x54f   : > { %2561 = vpow2.f32 %v1300_v42 }
 0x552   : > { %v1291_v40 = vpop.xlane.xlu1 %1290 }
 0x553   : > { %v1295_v37 = vsub.f32 %v1279_v13, %v1291_v40 }
 0x555   : > { %v1302_v45 = vmul.f32 1.442695, %v1295_v37  ;;  %v2964_v46 = vpop.eup %2561 }
 0x556   : > { %v1310_v48 = vsel %vm1191_vm7, %v2964_v46, 0.0 }
 0x557   : > { %2563 = vpow2.f32 %v1302_v45 }
 0x558   : > { %2565 = vpow2.f32 %v1296_v38 }
 0x55d   : > { %v2966_v47 = vpop.eup %2563 }
 0x55e   : > { %1311 = vadd.xlane.f32.xlu2 %v1310_v48  ;;  %v1313_v49 = vsel %vm1191_vm7, %v2966_v47, 0.0  ;;  %v2972_v39 = vpop.eup %2565 }
 0x55f   : > { %1314 = vadd.xlane.f32.xlu1 %v1313_v49  ;;  %v1304_v50 = vsel %vm1191_vm7, %v2972_v39, 0.0 }
 0x566   : > { %1305 = vadd.xlane.f32.xlu0 %v1304_v50 }
 0x58e   : > { %v2513_v52 = vpop.trf.xlu2 }
 0x58f   : > { %v1457_v53 = vsel %vm526_vm5, %v1456_v34, %v2513_v52 }
 0x590   : > { %v1461_v36 = vperm.slane %v1457_v53, %v2822_v51 }
 0x592   : > { %v1470_v59 = vrot.slane %v1461_v36, 4 }
 0x596   : > { %v2514_v56 = vpop.trf.xlu2 }
 0x597   : > { %v1485_v61 = vsel %vm526_vm5, %v1484_v57, %v2514_v56 }
 0x598   : > { %v1489_v0 = vperm.slane %v1485_v61, %v2822_v51 }
 0x59a   : > { %v1498_v9 = vrot.slane %v1489_v0, 4 }
 0x5a1   : > { %v2516_v54 = vpop.trf.xlu0 }
 0x5a2   : > { %v1462_v55 = vrot.slane %v2516_v54, 4 }
 0x5a4   : > { %v1463_v58 = vsel %vm526_vm5, %v1462_v55, %v2519_v27 }
 0x5a5   : > { %v1467_v60 = vperm.slane %v1463_v58, %v2822_v51 }
 0x5a7   : > { %v1468_v62 = vrot.slane %v1467_v60, 4  ;;  %v1471_v63 = vsel %vm526_vm5, %v1467_v60, %v1470_v59 }
 0x5a8   : > { %v1479_v3 = vperm.slane %v1471_v63, %v2831_v1 }
 0x5a9   : > { %v1469_v2 = vsel %vm526_vm5, %v1468_v62, %v1461_v36  ;;  %v2517_v4 = vpop.trf.xlu0 }
 0x5aa   : > { %v1490_v5 = vrot.slane %v2517_v4, 4  ;;  %v1475_v6 = vperm.slane %v1469_v2, %v2831_v1  ;;  %v1482_v11 = vrot.slane %v1479_v3, 4  ;;  %v1532_v17 = vshrl.u32 %v1479_v3, 16 }
 0x5ac   : > { %v1491_v7 = vsel %vm526_vm5, %v1490_v5, %v2520_v30  ;;  %v1480_v14 = vrot.slane %v1475_v6, 4  ;;  %v1483_v18 = vsel %vm526_vm5, 0, %v1482_v11  ;;  %v1516_v24 = vshrl.u32 %v1475_v6, 16 }
 0x5ad   : > { %v1495_v10 = vperm.slane %v1491_v7, %v2822_v51  ;;  %v1540_v30 = vshrl.u32 %v1483_v18, 16 }
 0x5ae   : > { %v1481_v23 = vsel %vm526_vm5, 0, %v1480_v14 }
 0x5af   : > { %v1496_v12 = vrot.slane %v1495_v10, 4  ;;  %v1499_v13 = vsel %vm526_vm5, %v1495_v10, %v1498_v9  ;;  %v1524_v41 = vshrl.u32 %v1481_v23, 16 }
 0x5b0   : > { %v1507_v15 = vperm.slane %v1499_v13, %v2831_v1 }
 0x5b1   : > { %v1497_v16 = vsel %vm526_vm5, %v1496_v12, %v1489_v0 }
 0x5b2   : > { %v1503_v19 = vperm.slane %v1497_v16, %v2831_v1  ;;  %v1530_v20 = vpack.i.b16 %v1507_v15, %v1479_v3  ;;  %v1533_v21 = vshrl.u32 %v1507_v15, 16  ;;  %v1510_v22 = vrot.slane %v1507_v15, 4 }
 0x5b4   : > { %v1534_v25 = vpack.i.b16 %v1533_v21, %v1532_v17  ;;  %v1511_v26 = vsel %vm526_vm5, 0, %v1510_v22  ;;  %v1508_v27 = vrot.slane %v1503_v19, 4  ;;  %v1514_v28 = vpack.i.b16 %v1503_v19, %v1475_v6 }
 0x5b5   : > { %v1538_v29 = vpack.i.b16 %v1511_v26, %v1483_v18  ;;  %v1541_v31 = vshrl.u32 %v1511_v26, 16  ;;  %v1517_v33 = vshrl.u32 %v1503_v19, 16 }
 0x5b6   : > { %2527 = vxpose.binary.xlu0.c.b16.start.end [1/2] (short) (narrow) %v1534_v25, %v1530_v20, 16  ;;  %v1509_v35 = vsel %vm526_vm5, 0, %v1508_v27 }
 0x5b7   : > { %v1542_v42 = vpack.i.b16 %v1541_v31, %v1540_v30  ;;  %v1522_v43 = vpack.i.b16 %v1509_v35, %v1481_v23  ;;  %v1525_v40 = vshrl.u32 %v1509_v35, 16  ;;  %v1518_v37 = vpack.i.b16 %v1517_v33, %v1516_v24 }
 0x5b9   : > { %2521 = vxpose.binary.xlu1.c.b16.start.end [1/2] (short) (narrow) %v1542_v42, %v1538_v29, 16  ;;  %v1526_v44 = vpack.i.b16 %v1525_v40, %v1524_v41 }
 0x5bb   : > { %2524 = vxpose.binary.xlu2.c.b16.start.end [1/2] (short) (narrow) %v1526_v44, %v1522_v43, 16 }
 0x5bf   : > { %v1309_v45 = vpop.xlane.xlu1 %1308 }
 0x5c0   : > { %2567 = vrcp.f32 %v1309_v45 }
 0x5c6   : > { %v2568_v38 = vpop.eup %2567 }
 0x5c7   : > { %v1321_v48 = vmul.f32 %v2568_v38, %v2960_v32 }
 0x5c9   : > { %v1325_v49 = vpack.c.bf16 %v1321_v48, %v1321_v48 }
 0x5cb   : > { %2530 = vxpose.binary.xlu2.c.b16.start.end [1/2] (short) (narrow) %v1518_v37, %v1514_v28, 16  ;;  %v1747_v50 = vsel %vm1191_vm7, %v1325_v49, 0 }
 0x5cc   : > { %1756 = vmatpush.bf16.xpose.msrb.mxu3 %v1747_v50 }
 0x5d1   : > { %v1312_v52 = vpop.xlane.xlu2 %1311 }
 0x5d2   : > { %2569 = vrcp.f32 %v1312_v52  ;;  %v1315_v34 = vpop.xlane.xlu1 %1314 }
 0x5d3   : > { %2571 = vrcp.f32 %v1315_v34 }
 0x5d8   : > { %v2570_v53 = vpop.eup %2569 }
 0x5d9   : > { %v2572_v36 = vpop.eup %2571  ;;  %v1306_v54 = vpop.xlane.xlu0 %1305  ;;  %v1322_v55 = vmul.f32 %v2570_v53, %v2964_v46 }
 0x5da   : > { %2573 = vrcp.f32 %v1306_v54  ;;  %v1323_v56 = vmul.f32 %v2572_v36, %v2966_v47 }
 0x5db   : > { %v1326_v57 = vpack.c.bf16 %v1322_v55, %v1322_v55 }
 0x5dc   : > { %v1327_v58 = vpack.c.bf16 %v1323_v56, %v1323_v56 }
 0x5dd   : > { %v1766_v32 = vsel %vm1191_vm7, %v1326_v57, 0 }
 0x5de   : > { %1775 = vmatpush.bf16.xpose.msra.mxu1 %v1766_v32  ;;  %v1785_v59 = vsel %vm1191_vm7, %v1327_v58, 0 }
 0x5e0   : > { %v2574_v60 = vpop.eup %2573 }
 0x5e1   : > { %v1320_v61 = vmul.f32 %v2574_v60, %v2972_v39 }
 0x5e3   : > { %v1324_v62 = vpack.c.bf16 %v1320_v61, %v1320_v61 }
 0x5e5   : > { %v1728_v63 = vsel %vm1191_vm7, %v1324_v62, 0 }
 0x5e6   : > { %1794 = vmatpush.bf16.xpose.msrb.mxu1 %v1785_v59  ;;  %1737 = vmatpush.bf16.xpose.msrb.mxu2 %v1728_v63 }
 0x65c   : > { %v2525_v0 = vpop.trf.xlu2 }
 0x662   : > { %v2528_v2 = vpop.trf.xlu0 }
 0x663   : > { %v1672_v5 = vrot.slane %v2528_v2, 4 }
 0x664   : > { %v2526_v46 = vpop.trf.xlu2 }
 0x665   : > { %v2522_v3 = vpop.trf.xlu1 }
 0x666   : > { %v1678_v47 = vrot.slane %v2522_v3, 4 }
 0x668   : > { %v1679_v4 = vsel %vm526_vm5, %v1678_v47, %v2525_v0 }
 0x669   : > { %v1683_v6 = vperm.slane %v1679_v4, %v2822_v51 }
 0x66a   : > { %v2529_v12 = vpop.trf.xlu0 }
 0x66b   : > { %v1684_v13 = vrot.slane %v1683_v6, 4  ;;  %v1692_v15 = vrot.slane %v2529_v12, 4 }
 0x66c   : > { %v2531_v7 = vpop.trf.xlu2 }
 0x66d   : > { %v1673_v9 = vsel %vm526_vm5, %v1672_v5, %v2531_v7  ;;  %v2523_v10 = vpop.trf.xlu1 }
 0x66e   : > { %v1677_v39 = vperm.slane %v1673_v9, %v2822_v51  ;;  %v1698_v11 = vrot.slane %v2523_v10, 4 }
 0x670   : > { %v1699_v14 = vsel %vm526_vm5, %v1698_v11, %v2526_v46  ;;  %v1685_v16 = vsel %vm526_vm5, %v1684_v13, %v1677_v39 }
 0x671   : > { %v1703_v17 = vperm.slane %v1699_v14, %v2822_v51  ;;  %v1689_v19 = vperm.slane %v1685_v16, %v2831_v1 }
 0x673   : > { %v1704_v21 = vrot.slane %v1703_v17, 4  ;;  %v1690_v24 = vrot.slane %v1689_v19, 4  ;;  %v1715_v28 = vshrl.u32 %v1689_v19, 16 }
 0x674   : > { %v2532_v18 = vpop.trf.xlu2 }
 0x675   : > { %v1693_v20 = vsel %vm526_vm5, %v1692_v15, %v2532_v18  ;;  %v1691_v31 = vsel %vm526_vm5, 0, %v1690_v24 }
 0x676   : > { %v1697_v22 = vperm.slane %v1693_v20, %v2822_v51  ;;  %v1721_v42 = vshrl.u32 %v1691_v31, 16 }
 0x678   : > { %v1705_v23 = vsel %vm526_vm5, %v1704_v21, %v1697_v22 }
 0x679   : > { %v1709_v25 = vperm.slane %v1705_v23, %v2831_v1 }
 0x67b   : > { %v1710_v26 = vrot.slane %v1709_v25, 4  ;;  %v1714_v27 = vpack.i.b16 %v1709_v25, %v1689_v19  ;;  %v1716_v29 = vshrl.u32 %v1709_v25, 16 }
 0x67d   : > { %2341 = vmatmul.msk.bf16.vlgmr.msrb.gmra.mxu2 %vm1191_vm7, %v1714_v27  ;;  %v1717_v30 = vpack.i.b16 %v1716_v29, %v1715_v28  ;;  %v1711_v33 = vsel %vm526_vm5, 0, %v1710_v26 }
 0x67e   : > { %v1720_v35 = vpack.i.b16 %v1711_v33, %v1691_v31  ;;  %v1722_v41 = vshrl.u32 %v1711_v33, 16 }
 0x67f   : > { %2342 = vmatmul.msk.bf16.vlgmr.msrb.gmra.mxu3 %vm1191_vm7, %v1717_v30 }
 0x680   : > { %2343 = vmatmul.msk.bf16.vlgmr.msra.gmra.mxu1 %vm1191_vm7, %v1720_v35  ;;  %v1723_v43 = vpack.i.b16 %v1722_v41, %v1721_v42 }
 0x690   : > { %2344 = vmatmul.msk.bf16.vlgmr.msrb.gmra.mxu1 %vm1191_vm7, %v1723_v43 }
 0x6fd   : > { %v1777_v40 = vpop.f32.mrf.mxu1 }
 0x700   : > { %v1739_v37 = vpop.f32.mrf.mxu2 }
 0x701   : > { %v2533_v44 = vpack.i.bf16 %v1739_v37, %v1777_v40 }
 0x702   : > { %v1758_v45 = vpop.f32.mrf.mxu3 }
 0x703   : > { %2534 = vxpose.xlu0.b32.start.end [1/1] (short) (narrow) %v2533_v44, 8 }
 0x705   : > { %v1779_v38 = vpop.f32.mrf.mxu1 }
 0x708   : > { %v1741_v48 = vpop.f32.mrf.mxu2 }
 0x70a   : > { %v1760_v49 = vpop.f32.mrf.mxu3 }
 0x70d   : > { %v1796_v50 = vpop.f32.mrf.mxu1 }
 0x70e   : > { %v2540_v52 = vpack.i.bf16 %v1758_v45, %v1796_v50 }
 0x710   : > { %2541 = vxpose.xlu1.b32.start.end [1/1] (short) (narrow) %v2540_v52, 8 }
 0x715   : > { %v1798_v34 = vpop.f32.mrf.mxu1 }
 0x7a7   : > { %v2535_v53 = vpop.trf.xlu0 }
 0x7a8   : > { %v2539_v36 = vunpack.i.h.bf16 %v2535_v53  ;;  %v2536_v54 = vunpack.i.l.bf16 %v2535_v53 }
 0x7aa   : > { %v1930_v55 = vrot.slane %v2539_v36, 4  ;;  %v1928_v56 = vrot.slane %v2536_v54, 4 }
 0x7ac   : > { %v1929_v57 = vsel %vm526_vm5, %v1928_v56, %v2539_v36  ;;  %v1931_v58 = vsel %vm526_vm5, %v2536_v54, %v1930_v55 }
 0x7ad   : > { %v1935_v61 = vperm.slane %v1929_v57, %v2822_v51  ;;  %v1939_v62 = vperm.slane %v1931_v58, %v2822_v51  ;;  %v2401_v58 = vld [vmem:[%s3164_s5] sm:$0xff] }
 0x7af   : > { %v1954_v3 = vrot.slane %v1935_v61, 4  ;;  %v1966_v47 = vrot.slane %v1939_v62, 4 }
 0x7b4   : > { %v2542_v32 = vpop.trf.xlu1 }
 0x7b5   : > { %v2546_v59 = vunpack.i.h.bf16 %v2542_v32  ;;  %v2543_v60 = vunpack.i.l.bf16 %v2542_v32 }
 0x7b7   : > { %v1942_v63 = vrot.slane %v2546_v59, 4  ;;  %v1940_v0 = vrot.slane %v2543_v60, 4 }
 0x7b9   : > { %v1941_v46 = vsel %vm526_vm5, %v1940_v0, %v2546_v59  ;;  %v1943_v2 = vsel %vm526_vm5, %v2543_v60, %v1942_v63 }
 0x7ba   : > { %v1947_v4 = vperm.slane %v1941_v46, %v2822_v51  ;;  %v1951_v5 = vperm.slane %v1943_v2, %v2822_v51  ;;  %v2550_v46 = vld [vmem:[%s3165_s6] ss:$0 sm:$0xff] }
 0x7bc   : > { %v1952_v6 = vrot.slane %v1947_v4, 4  ;;  %v1955_v7 = vsel %vm526_vm5, %v1947_v4, %v1954_v3  ;;  %v1964_v9 = vrot.slane %v1951_v5, 4  ;;  %v1967_v10 = vsel %vm526_vm5, %v1951_v5, %v1966_v47  ;;  %v2577_v47 = vld [vmem:[%s2776_s24] sm:$0xff]  ;;  %s429_s24 = sand.u32 1, %s2632_s26  }
 0x7bd   : > { %v1963_v39 = vperm.slane %v1955_v7, %v2831_v1  ;;  %v1975_v11 = vperm.slane %v1967_v10, %v2831_v1  ;;  %s2326_s22 = sshll.u32 %s429_s24, 3  ;;  %s2248_s29 = scalar_lea.sflag [#allocation3], %s429_s24 }
 0x7be   : > { %v1953_v12 = vsel %vm526_vm5, %v1952_v6, %v1935_v61  ;;  %v1965_v13 = vsel %vm526_vm5, %v1964_v9, %v1939_v62 }
 0x7bf   : > { %v1959_v14 = vperm.slane %v1953_v12, %v2831_v1  ;;  %v1971_v15 = vperm.slane %v1965_v13, %v2831_v1  ;;  %v1978_v16 = vrot.slane %v1963_v39, 4  ;;  %v1982_v17 = vrot.slane %v1975_v11, 4  ;;  %v2404_v12 = vld [vmem:[%s3168_s9 + $0x8] sm:$0xff]  ;;  %v2403_v13 = vld [vmem:[%s3168_s9] sm:$0xff] }
 0x7c0   : > { %2155 = vmatpush.bf16.msra.mxu3 %v2404_v12 }
 0x7c1   : > { %v1979_v18 = vsel %vm526_vm5, 0.0, %v1978_v16  ;;  %v1976_v19 = vrot.slane %v1959_v14, 4  ;;  %v1980_v20 = vrot.slane %v1971_v15, 4  ;;  %v1983_v21 = vsel %vm526_vm5, 0.0, %v1982_v17 }
 0x7c2   : > { %v1984_v22 = vsel %vm526_vm5, %v1978_v16, %v1959_v14  ;;  %v1989_v23 = vrot.slane %v1979_v18, 4  ;;  %v1995_v24 = vsel %vm526_vm5, %v1982_v17, %v1971_v15  ;;  %v2000_v25 = vrot.slane %v1983_v21, 4  ;;  %v2412_v14 = vld [vmem:[%s3170_s11 + $0x38] sm:$0xff]  ;;  %v2411_v17 = vld [vmem:[%s3170_s11 + $0x30] sm:$0xff] }
 0x7c3   : > { %v1977_v26 = vsel %vm526_vm5, 0.0, %v1976_v19  ;;  %v1981_v27 = vsel %vm526_vm5, 0.0, %v1980_v20  ;;  %v1988_v28 = vperm.slane %v1984_v22, %v2822_v51  ;;  %v1999_v29 = vperm.slane %v1995_v24, %v2822_v51  ;;  %2232 = vmatpush.bf16.msrb.mxu0 %v2412_v14  ;;  %v2410_v19 = vld [vmem:[%s3170_s11 + $0x28] sm:$0xff]  ;;  %v2409_v20 = vld [vmem:[%s3170_s11 + $0x20] sm:$0xff] }
 0x7c4   : > { %v1990_v30 = vsel %vm526_vm5, %v1989_v23, %v1977_v26  ;;  %v2001_v31 = vsel %vm526_vm5, %v2000_v25, %v1981_v27  ;;  %2156 = vmatpush.bf16.msra.mxu3 %v2403_v13  ;;  %v2407_v25 = vld [vmem:[%s3170_s11 + $0x10] sm:$0xff] }
 0x7c5   : > { %v1994_v33 = vperm.slane %v1990_v30, %v2822_v51  ;;  %v2005_v35 = vperm.slane %v2001_v31, %v2822_v51  ;;  %v2008_v41 = vrot.slane %v1988_v28, 4  ;;  %v2020_v42 = vrot.slane %v1999_v29, 4  ;;  %v2552_v31 = vld [vmem:[%s3167_s8] ss:$0 sm:$0xff] }
 0x7c7   : > { %v2009_v43 = vsel %vm526_vm5, %v1994_v33, %v2008_v41  ;;  %v2021_v40 = vsel %vm526_vm5, %v2005_v35, %v2020_v42  ;;  %v2006_v37 = vrot.slane %v1994_v33, 4  ;;  %v2018_v44 = vrot.slane %v2005_v35, 4  ;;  %2233 = vmatpush.bf16.msrb.mxu0 %v2411_v17  ;;  %v2406_v42 = vld [vmem:[%s3170_s11 + $0x8] sm:$0xff] }
 0x7c8   : > { %v2017_v45 = vperm.slane %v2009_v43, %v2831_v1  ;;  %v2029_v38 = vperm.slane %v2021_v40, %v2831_v1  ;;  %v2405_v43 = vld [vmem:[%s3170_s11] sm:$0xff] }
 0x7c9   : > { %v2007_v48 = vsel %vm526_vm5, %v2006_v37, %v1988_v28  ;;  %v2019_v49 = vsel %vm526_vm5, %v2018_v44, %v1999_v29  ;;  %v2551_v28 = vld [vmem:[%s3166_s7] ss:$0 sm:$0xff] }
 0x7ca   : > { %v2036_v50 = vrot.slane %v2017_v45, 4  ;;  %v2034_v52 = vrot.slane %v2029_v38, 4  ;;  %v2013_v51 = vperm.slane %v2007_v48, %v2831_v1  ;;  %v2025_v34 = vperm.slane %v2019_v49, %v2831_v1  ;;  %v2402_v1 = vld [vmem:[%s3164_s5 + $0x8] sm:$0xff]  ;;  %v2553_v40 = vld [vmem:[%s3169_s10] ss:$0 sm:$0xff] }
 0x7cb   : > { %2085 = vmatpush.bf16.msra.mxu2 %v2402_v1  ;;  %2234 = vmatpush.bf16.msrb.mxu0 %v2410_v19  ;;  %v2554_v49 = vld [vmem:[%s3171_s12] ss:$0 sm:$0xff] }
 0x7cc   : > { %v2037_v53 = vsel %vm526_vm5, %v2029_v38, %v2036_v50  ;;  %v2035_v36 = vsel %vm526_vm5, %v2034_v52, %v2017_v45  ;;  %v2030_v54 = vrot.slane %v2025_v34, 4  ;;  %v2032_v55 = vrot.slane %v2013_v51, 4 }
 0x7cd   : > { %2047 = vrot.lane.b32.xlu1 %v2037_v53, %s2650_s15  ;;  %2043 = vrot.lane.b32.xlu0 %v2035_v36, %s2651_s16 }
 0x7ce   : > { %v2033_v56 = vsel %vm526_vm5, %v2025_v34, %v2032_v55  ;;  %v2031_v57 = vsel %vm526_vm5, %v2030_v54, %v2013_v51 }
 0x7cf   : > { %2039 = vrot.lane.b32.xlu2 %v2033_v56, %s2652_s20  ;;  %2086 = vmatpush.bf16.msra.mxu2 %v2401_v58  ;;  %s431_s20 = scalar_lea.vmem [#allocation2], %s2326_s22  ;;  %s2598_s22 = scalar_lea.hbm %s3172_s13, 16 }
 0x7d0   : > { %2235 = vmatpush.bf16.msrb.mxu0 %v2409_v20  ;;  %s2260_s21 = sshll.u32 %s431_s20, 4  ;;  %p2600_p1 = scmp.lt.s32.totalorder %s2598_s22, %s2594_s0  ;;  %s2261_s21 = int_to_ptr.vmem [resolvable:$true] %s2260_s21 }
 0x7d2   : > { %p2601_p2 = por %p2600_p1, %p2599_p0 }
 0x7d4   : > { %p2602_p3 = pnand %p2601_p2, %p2597_p13 }
 0x829   : > { %v2040_v32 = vpop.permute.xlu2 %2039 }
 0x82a   : > { %v2050_v59 = vsel %vm1191_vm7, %v2031_v57, %v2040_v32 }
 0x83f   : > { %v2048_v60 = vpop.permute.xlu1 %2047  ;;  %v2044_v61 = vpop.permute.xlu0 %2043 }
 0x840   : > { %v2052_v62 = vsel %vm2051_vm9, %v2050_v59, %v2044_v61 }
 0x841   : > { %v2054_v63 = vsel %vm2053_vm10, %v2052_v62, %v2048_v60 }
 0x842   : > { %v2055_v0 = vpack.c.bf16 %v2054_v63, %v2054_v63 }
 0x844   : > { %2353 = vmatmul.msk.bf16.vlgmr.msra.gmra.mxu2 %vm440_vm0, %v2055_v0 }
 0x8c7   : > { %v2088_v2 = vpop.f32.mrf.mxu2 }
 0x8c8   : > { %v2089_v3 = vadd.f32 %v2550_v46, %v2088_v2 }
 0x8ca   : > { %v3074_v4 = vadd.f32 %v2577_v47, %v2089_v3 }
 0x8cc   : > { %v2095_v5 = vsel %vm440_vm0, %v3074_v4, 0.0 }
 0x8cd   : > { %2096 = vadd.xlane.f32.xlu1 %v2095_v5 }
 0x8cf   : > { %v2090_v6 = vpop.f32.mrf.mxu2 }
 0x940   : > { %v2097_v7 = vpop.xlane.xlu1 %2096 }
 0x941   : > { %v2098_v9 = vmul.f32 %v2097_v7, %v2780_v8 }
 0x943   : > { %v2099_v10 = vsub.f32 %v3074_v4, %v2098_v9 }
 0x945   : > { %v2100_v39 = vmul.f32 %v2099_v10, %v2099_v10 }
 0x947   : > { %v2101_v11 = vsel %vm440_vm0, %v2100_v39, 0.0 }
 0x948   : > { %2102 = vadd.xlane.f32.xlu2 %v2101_v11 }
 0x9bb   : > { %v2103_v15 = vpop.xlane.xlu2 %2102 }
 0x9bc   : > { %v2104_v16 = vmul.f32 %v2103_v15, %v2780_v8  ;;  %v2408_v8 = vld [vmem:[%s3170_s11 + $0x18] sm:$0xff] }
 0x9bd   : > { %2236 = vmatpush.bf16.msrb.mxu0 %v2408_v8 }
 0x9be   : > { %v2105_v18 = vadd.f32 1e-05, %v2104_v16 }
 0x9c0   : > { %2575 = vrsqrt.f32 %v2105_v18  ;;  %vm2112_vm12 = vweird.f32 %v2105_v18 }
 0x9c1   : > { %2237 = vmatpush.bf16.msrb.mxu0 %v2407_v25 }
 0x9c5   : > { %2238 = vmatpush.bf16.msrb.mxu0 %v2406_v42 }
 0x9c6   : > { %v2576_v21 = vpop.eup %2575 }
 0x9c7   : > { %v2107_v22 = vmul.f32 %v2576_v21, %v2105_v18  ;;  %vm2113_vm11 = vweird.f32 %v2576_v21 }
 0x9c8   : > { %vm2114_vm13 = vmor %vm2112_vm12, %vm2113_vm11 }
 0x9c9   : > { %v2108_v23 = vmul.f32 %v2576_v21, %v2107_v22  ;;  %2239 = vmatpush.bf16.msrb.mxu0 %v2405_v43 }
 0x9cb   : > { %v2109_v24 = vmul.f32 0.5, %v2108_v23 }
 0x9cd   : > { %v2110_v26 = vsub.f32 1.5, %v2109_v24 }
 0x9cf   : > { %v2111_v27 = vmul.f32 %v2576_v21, %v2110_v26 }
 0x9d1   : > { %v2115_v29 = vsel %vm2114_vm13, %v2576_v21, %v2111_v27 }
 0x9d2   : > { %v2116_v30 = vmul.f32 %v2115_v29, %v2099_v10 }
 0x9d4   : > { %v2120_v33 = vmul.f32 %v2551_v28, %v2116_v30 }
 0x9d6   : > { %v2124_v35 = vadd.f32 %v2552_v31, %v2120_v33 }
 0x9d8   : > { %v2125_v41 = vpack.c.bf16 %v2124_v35, %v2124_v35 }
 0x9da   : > { %2362 = vmatmul.msk.bf16.vlgmr.msra.gmra.mxu3 %vm440_vm0, %v2125_v41 }
 0xa5d   : > { %v2158_v37 = vpop.f32.mrf.mxu3 }
 0xa5e   : > { %v2159_v44 = vadd.f32 %v2553_v40, %v2158_v37 }
 0xa60   : > { %v2162_v45 = vmax.f32 %v2159_v44, 0.0 }
 0xa62   : > { %v2163_v38 = vpack.c.bf16 %v2162_v45, %v2162_v45 }
 0xa64   : > { %2240 = vmatmul.bf16.vlgmr.msrb.gmra.mxu0 %v2163_v38 }
 0xa65   : > { %v2160_v48 = vpop.f32.mrf.mxu3 }
 0xae1   : > { %v2241_v50 = vpop.f32.mrf.mxu0 }
 0xae2   : > { %v2242_v52 = vadd.f32 %v2554_v49, %v2241_v50 }
 0xae4   : > { %v2245_v51 = vadd.f32 %v2242_v52, %v3074_v4 }
 0xae6   : > { %2246 = vst.msk [vmem:[%s431_s20] sm:$0xff] %vm440_vm0, %v2245_v51 }
 0xae7   : > { %2605 = shalt.err (!%p2602_p3)
}
 0xae8   : > { %2413 = dma.vmem_to_hbm [thread:$0]  (%p2761_p5), %s2261_s21, 128, %s2263_s2, %s2248_s29  }
 0xae9   : > { %v2243_v34 = vpop.f32.mrf.mxu0 }
 0xaea PF: > { %p2419_p4 = scmp.ge.s32.totalorder %s2640_s28, 2  ;;  %s2274_s24 = sand.u32 1, %s2628_s25  }
 0xaeb   : > { %s2275_s16 = scalar_lea.sflag [#allocation3], %s2274_s24 }
 0xaec   : > { %p2416_p7 = pnand %p2419_p4, %p2765_p6 }
 0xaee   : > { %p2417_p8 = pneg %p2416_p7 }
 0xaf0   : > { %2623 = dma.done.wait (%p2417_p8), %s2275_s16, 128  }
 0xaf1   : > { %2625 = vsyncadd (%p2417_p8), %s2275_s16, 4294967168  ;;  %p23_p9 = scmp.ge.s32.totalorder %s2748_s14, 4   ;;  %s3183_s25 = smov %s2632_s26 }
 0xaf2   : > { %s3184_s26 = smov %s2636_s27  ;;  %s3185_s27 = smov %s2759_s17 }
 0xaf3   : > { %s3186_s28 = smov %s2748_s14  ;;  %25 = sbr.rel (!%p23_p9) target bundleno = 8 (0x8), region = 107 }
 0xaf8   :  { %2281 = vsyncpa [#allocation3], 1 }
 0xaf9   :  { %2283 = vsyncpa [#allocation3 + $0x1], 1 }

</bundles_post_ra>
